<compile_context>
chip_gen: v6e
topology: v6e:2x2x1
jax: 0.10.0
libtpu: 0.0.40
codegen_flags: <defaults>
</compile_context>

<pallas_src>
import functools

import numpy as np
import jax
import jax.numpy as jnp
from jax.experimental import pallas as pl
from jax.experimental.pallas import tpu as pltpu


# ---------------------------------------------------------------------------
# Kernel
# ---------------------------------------------------------------------------
def _resplain_kernel(x_ref, sa_ref, ba_ref, wa_ref, sb_ref, bb_ref, wb_ref,
                     o_ref, *, h):
    """One batch-block of the ResPlain forward pass.

    x_ref        : (rows, L) lane-packed f32 activations,
                   rows = groups_per_step * h, L = lane_pack * W * C
    sa/ba, sb/bb : (1, L) folded BN scale/shift tiled over (lane_pack * W)
    wa/wb        : (3, L, L) banded row-conv weight (bf16), one slice per
                   conv-kernel row kh; block-diagonal over lane_pack
    """
    rows = x_ref.shape[0]

    # 0/1 boundary masks for the +-1 row halo: zero the row that wrapped across
    # a per-image boundary (this realises the conv's zero padding along H).
    row = jax.lax.broadcasted_iota(jnp.int32, (rows, 1), 0)
    not_first = (row % h != 0).astype(jnp.float32)      # a valid row h-1 exists
    not_last = (row % h != h - 1).astype(jnp.float32)   # a valid row h+1 exists

    def bn_relu(v, s_ref, b_ref):
        # eval-mode BN folded to per-channel scale/shift, then ReLU (f32, VPU).
        return jnp.maximum(v * s_ref[...] + b_ref[...], 0.0)

    def conv3x3(v, w_ref):
        # +-1 row halo on the XLU (sublane roll) + VPU mask; the W-band and
        # channel mixing are three bf16 MXU matmuls with f32 accumulation
        # (no (rows, 3L) patch buffer is built).
        up = pltpu.roll(v, shift=1, axis=0) * not_first          # row h-1
        dn = pltpu.roll(v, shift=rows - 1, axis=0) * not_last    # row h+1
        wd = w_ref.dtype
        acc = jnp.dot(up.astype(wd), w_ref[0], preferred_element_type=jnp.float32)
        acc += jnp.dot(v.astype(wd), w_ref[1], preferred_element_type=jnp.float32)
        acc += jnp.dot(dn.astype(wd), w_ref[2], preferred_element_type=jnp.float32)
        return acc

    y = bn_relu(x_ref[...], sa_ref, ba_ref)   # bn_a + relu_a
    y = conv3x3(y, wa_ref)                    # conv_a : 3x3, stride 1, pad 1, no bias
    y = bn_relu(y, sb_ref, bb_ref)            # bn_b + relu_b
    y = conv3x3(y, wb_ref)                    # conv_b : 3x3, stride 1, pad 1, no bias
    # Residual add; self.active == PolyActive('fx') == identity.  x_ref is
    # re-read here instead of keeping `skip` live across both conv phases.
    o_ref[...] = (x_ref[...] + y).astype(o_ref.dtype)


# ---------------------------------------------------------------------------
# Host-side weight packing (trace-time, numpy)
# ---------------------------------------------------------------------------
def _build_row_conv_weight(w_hwio, width, lane_pack):
    """(3,3,Cin,Cout) HWIO conv weight ->
       (3, lane_pack*width*Cin, lane_pack*width*Cout) banded row-conv weight.

    Right-multiplying the lane-packed activation rows h-1 / h / h+1 (lanes =
    (w, ci) fast) by slices kh=0/1/2 and summing yields the packed conv output
    row (stride 1, padding 1 along W).  The lane_pack image copies are laid out
    block-diagonally so images sharing a matmul row never mix."""
    w = np.asarray(w_hwio, np.float32)
    kh, kw, cin, cout = w.shape
    assert kh == 3 and kw == 3
    band = np.zeros((3, width * cin, width * cout), np.float32)
    for w_out in range(width):
        for dw in range(3):
            w_in = w_out + dw - 1
            if 0 <= w_in < width:
                band[:, w_in * cin:(w_in + 1) * cin,
                        w_out * cout:(w_out + 1) * cout] = w[:, dw]
    if lane_pack == 1:
        return band
    li, lo = width * cin, width * cout
    big = np.zeros((3, lane_pack * li, lane_pack * lo), np.float32)
    for j in range(lane_pack):
        big[:, j * li:(j + 1) * li, j * lo:(j + 1) * lo] = band
    return big


def _pick_groups_per_step(n_groups, h, max_rows):
    """Largest per-step group count whose block fits max_rows rows, preferring
    an even grid of >= 2 steps so v7x megacore can split the batch axis."""
    divisors = [d for d in range(1, n_groups + 1) if n_groups % d == 0]
    fitting = [d for d in divisors if d * h <= max_rows] or [1]
    even = [d for d in fitting if (n_groups // d) >= 2 and (n_groups // d) % 2 == 0]
    return max(even) if even else max(fitting)


# ---------------------------------------------------------------------------
# Wrappers
# ---------------------------------------------------------------------------
def resplain_forward_nhwc(x_nhwc, params, *, matmul_dtype=jnp.bfloat16,
                          lane_pack=2, groups_per_step=None, max_rows=512):
    """ResPlain forward (Type='normal', stride=1, no downsample, fname='fx').

    x_nhwc: (N, H, W, C) float32, channels last (no NCHW<->NHWC transposes).
    params: (scale_a, shift_a, w_a_hwio, scale_b, shift_b, w_b_hwio) with the
    BN running stats folded into scale/shift and HWIO (3,3,C,C) conv weights.
    lane_pack images are packed side by side into the lane axis
    (L = lane_pack*W*C): use 2 on v6e/v7x (256-wide MXU), 1 on v5e."""
    scale_a, shift_a, w_a, scale_b, shift_b, w_b = params
    N, H, W, C = x_nhwc.shape
    assert x_nhwc.dtype == jnp.float32, "BN/ReLU/residual are computed in f32"

    if N % lane_pack != 0:
        lane_pack = 1
    L = lane_pack * W * C
    assert L % 128 == 0, "lane_pack * W * C must be a multiple of 128 (lane-dense)"
    n_groups = N // lane_pack
    gps = (groups_per_step if groups_per_step is not None
           else _pick_groups_per_step(n_groups, H, max_rows))
    assert n_groups % gps == 0, "batch groups must divide groups_per_step"
    rows = gps * H
    assert rows % 8 == 0, "block rows must be a multiple of 8 (sublane tiling)"
    grid = (n_groups // gps,)

    itemsize = jnp.dtype(matmul_dtype).itemsize
    # Guard: the banded weight grows as (lane_pack*W*C)^2; deeper ResPlain
    # stages (e.g. C=64, W=56) must instead tile along W or use a per-dw
    # shift-accumulate formulation with C as the matmul K dimension.
    weight_bytes = 2 * 3 * L * L * itemsize
    assert weight_bytes <= 16 * 1024 * 1024, (
        f"banded conv weights need {weight_bytes / 2**20:.1f} MiB of VMEM; "
        "this kernel only targets small W*C stages")

    # Lane packing: (N,H,W,C) -> (n_groups*H, L) with lanes
    # [img j=0: (w,c) | img j=1: (w,c) | ...].  For lane_pack==1 this is a free
    # row-major reshape; for lane_pack>1 it is one small relayout that NCHW
    # callers can fuse into the NCHW->NHWC transpose they already pay.
    xp = x_nhwc.reshape(n_groups, lane_pack, H, W * C)
    xp = jnp.transpose(xp, (0, 2, 1, 3)).reshape(n_groups * H, L)

    # Folded BN scale/shift tiled over (lane_pack * W) so they broadcast in lanes.
    sa = jnp.tile(scale_a.astype(jnp.float32), lane_pack * W).reshape(1, L)
    ba = jnp.tile(shift_a.astype(jnp.float32), lane_pack * W).reshape(1, L)
    sb = jnp.tile(scale_b.astype(jnp.float32), lane_pack * W).reshape(1, L)
    bb = jnp.tile(shift_b.astype(jnp.float32), lane_pack * W).reshape(1, L)

    # Host-side banded row-conv weights (trace-time numpy, bf16 for the MXU).
    wa_big = jnp.asarray(_build_row_conv_weight(w_a, W, lane_pack), matmul_dtype)
    wb_big = jnp.asarray(_build_row_conv_weight(w_b, W, lane_pack), matmul_dtype)

    total_rows = n_groups * H
    flops = int(2 * 3 * 2 * total_rows * L * L)            # six band matmuls
    bytes_accessed = int(2 * total_rows * L * 4             # activations in + out
                         + 2 * 3 * L * L * itemsize         # two band weights
                         + 4 * L * 4)                       # BN scale/shift

    img_spec = pl.BlockSpec((rows, L), lambda b: (b, 0))
    vec_spec = pl.BlockSpec((1, L), lambda b: (0, 0))
    w_spec = pl.BlockSpec((3, L, L), lambda b: (0, 0, 0))
    # NOTE: pipeline_mode=pl.Buffered(1) on the constant-index operands (weights
    # and BN vectors) would drop their second pipeline buffer; they total well
    # under 1 MiB here, so the default is kept for lowering compatibility.

    out_packed = pl.pallas_call(
        functools.partial(_resplain_kernel, h=H),
        out_shape=jax.ShapeDtypeStruct((total_rows, L), x_nhwc.dtype),
        grid_spec=pltpu.PrefetchScalarGridSpec(
            num_scalar_prefetch=0,
            grid=grid,
            in_specs=[img_spec, vec_spec, vec_spec, w_spec,
                      vec_spec, vec_spec, w_spec],
            out_specs=img_spec),
        compiler_params=pltpu.CompilerParams(
            dimension_semantics=("parallel",),
            vmem_limit_bytes=64 * 1024 * 1024),
        cost_estimate=pl.CostEstimate(flops=flops, transcendentals=0,
                                      bytes_accessed=bytes_accessed),
    )(xp, sa, ba, wa_big, sb, bb, wb_big)

    out = out_packed.reshape(n_groups, H, lane_pack, W * C)
    return jnp.transpose(out, (0, 2, 1, 3)).reshape(N, H, W, C)


def resplain_forward_nchw(x_nchw, params, **kwargs):
    """PyTorch-interface (NCHW) convenience wrapper."""
    # TODO(synk): these transposes are extra HBM round trips on a memory-bound
    # kernel; keep the surrounding model channels-last and call
    # resplain_forward_nhwc directly in production.
    x = jnp.transpose(x_nchw, (0, 2, 3, 1))
    y = resplain_forward_nhwc(x, params, **kwargs)
    return jnp.transpose(y, (0, 3, 1, 2))


# ---------------------------------------------------------------------------
# Pure-JAX reference and test harness
# ---------------------------------------------------------------------------
def _reference_nhwc(x, scale_a, shift_a, w_a, scale_b, shift_b, w_b,
                    conv_dtype=jnp.float32):
    """Pure-JAX reference (lax.conv).  conv_dtype=bfloat16 mirrors the kernel's
    MXU input rounding (accumulation stays f32 in both)."""
    skip = x
    y = jnp.maximum(x * scale_a + shift_a, 0.0)
    y = jax.lax.conv_general_dilated(
        y.astype(conv_dtype), w_a.astype(conv_dtype),
        window_strides=(1, 1), padding=((1, 1), (1, 1)),
        dimension_numbers=('NHWC', 'HWIO', 'NHWC'),
        preferred_element_type=jnp.float32)
    y = jnp.maximum(y * scale_b + shift_b, 0.0)
    y = jax.lax.conv_general_dilated(
        y.astype(conv_dtype), w_b.astype(conv_dtype),
        window_strides=(1, 1), padding=((1, 1), (1, 1)),
        dimension_numbers=('NHWC', 'HWIO', 'NHWC'),
        preferred_element_type=jnp.float32)
    return skip + y


def _fold_bn(gamma, beta, mean, var, eps=1e-5):
    scale = gamma / jnp.sqrt(var + eps)
    shift = beta - mean * scale
    return scale, shift


if __name__ == "__main__":
    # inplanes == planes == 8, stride == 1, W*C == 128 (lane-dense base layout).
    N, C, H, W = 4, 8, 16, 16
    key = jax.random.PRNGKey(0)
    keys = jax.random.split(key, 12)

    x_nhwc = jax.random.normal(keys[0], (N, H, W, C), jnp.float32)

    # Conv weights in PyTorch layout (O, I, 3, 3) -> HWIO.
    w_a_oihw = 0.1 * jax.random.normal(keys[1], (C, C, 3, 3), jnp.float32)
    w_b_oihw = 0.1 * jax.random.normal(keys[2], (C, C, 3, 3), jnp.float32)
    w_a = jnp.transpose(w_a_oihw, (2, 3, 1, 0))
    w_b = jnp.transpose(w_b_oihw, (2, 3, 1, 0))

    # BatchNorm (eval-mode) parameters, folded into scale/shift.
    g_a = 1.0 + 0.1 * jax.random.normal(keys[3], (C,), jnp.float32)
    b_a = 0.1 * jax.random.normal(keys[4], (C,), jnp.float32)
    m_a = 0.1 * jax.random.normal(keys[5], (C,), jnp.float32)
    v_a = 1.0 + 0.1 * jax.random.uniform(keys[6], (C,), jnp.float32)
    g_b = 1.0 + 0.1 * jax.random.normal(keys[7], (C,), jnp.float32)
    b_b = 0.1 * jax.random.normal(keys[8], (C,), jnp.float32)
    m_b = 0.1 * jax.random.normal(keys[9], (C,), jnp.float32)
    v_b = 1.0 + 0.1 * jax.random.uniform(keys[10], (C,), jnp.float32)

    scale_a, shift_a = _fold_bn(g_a, b_a, m_a, v_a)
    scale_b, shift_b = _fold_bn(g_b, b_b, m_b, v_b)
    params = (scale_a, shift_a, w_a, scale_b, shift_b, w_b)

    # v6e/v7x path: two images per matmul row (256 lanes), even grid of 2 steps.
    out = resplain_forward_nhwc(x_nhwc, params, lane_pack=2)
    out = jax.block_until_ready(out)
    assert out.shape == (N, H, W, C)

    # Tight check against a reference with matched bf16 MXU-input rounding.
    ref_bf16 = _reference_nhwc(x_nhwc, scale_a, shift_a, w_a, scale_b, shift_b,
                               w_b, conv_dtype=jnp.bfloat16)
    assert jnp.allclose(out, ref_bf16, atol=1e-2, rtol=1e-2), \
        f"max abs err vs bf16 reference {jnp.max(jnp.abs(out - ref_bf16))}"
    # Looser check against the full-f32 reference (original module semantics).
    ref_f32 = _reference_nhwc(x_nhwc, scale_a, shift_a, w_a, scale_b, shift_b,
                              w_b, conv_dtype=jnp.float32)
    assert jnp.allclose(out, ref_f32, atol=5e-2, rtol=5e-2), \
        f"max abs err vs f32 reference {jnp.max(jnp.abs(out - ref_f32))}"

    # v5e-style 128-lane path, exercised through the NCHW interface wrapper.
    out_nchw = resplain_forward_nchw(jnp.transpose(x_nhwc, (0, 3, 1, 2)),
                                     params, lane_pack=1)
    out_nchw = jax.block_until_ready(out_nchw)
    assert jnp.allclose(jnp.transpose(out_nchw, (0, 2, 3, 1)), out,
                        atol=1e-2, rtol=1e-2), "lane_pack=1 and lane_pack=2 disagree"

    print("KERNEL_OK")
</pallas_src>

<mosaic_0001>
module attributes {stable_mosaic.version = 11 : i64} {
  func.func @_resplain_kernel(%arg0: i32, %arg1: memref<16x256xf32, #tpu.memory_space<vmem>>, %arg2: memref<1x256xf32, #tpu.memory_space<vmem>>, %arg3: memref<1x256xf32, #tpu.memory_space<vmem>>, %arg4: memref<3x256x256xbf16, #tpu.memory_space<vmem>>, %arg5: memref<1x256xf32, #tpu.memory_space<vmem>>, %arg6: memref<1x256xf32, #tpu.memory_space<vmem>>, %arg7: memref<3x256x256xbf16, #tpu.memory_space<vmem>>, %arg8: memref<16x256xf32, #tpu.memory_space<vmem>>) attributes {dimension_semantics = [#tpu.dimension_semantics<parallel>], iteration_bounds = array<i64: 2>, scalar_prefetch = 0 : i64, scratch_operands = 0 : i64, tpu.core_type = #tpu.core_type<tc>, window_params = [{transform_indices = @transform_0, window_bounds = array<i64: 16, 256>}, {pipeline_mode = #tpu.pipeline_mode<synchronous>, transform_indices = @transform_1, window_bounds = array<i64: 1, 256>}, {pipeline_mode = #tpu.pipeline_mode<synchronous>, transform_indices = @transform_2, window_bounds = array<i64: 1, 256>}, {pipeline_mode = #tpu.pipeline_mode<synchronous>, transform_indices = @transform_3, window_bounds = array<i64: 3, 256, 256>}, {pipeline_mode = #tpu.pipeline_mode<synchronous>, transform_indices = @transform_4, window_bounds = array<i64: 1, 256>}, {pipeline_mode = #tpu.pipeline_mode<synchronous>, transform_indices = @transform_5, window_bounds = array<i64: 1, 256>}, {pipeline_mode = #tpu.pipeline_mode<synchronous>, transform_indices = @transform_6, window_bounds = array<i64: 3, 256, 256>}, {transform_indices = @transform_7, window_bounds = array<i64: 16, 256>}]} {
    %0 = tpu.iota {dimensions = array<i32: 0>} : vector<16x1xi32>
    %c16_i32 = arith.constant 16 : i32
    %c0_i32 = arith.constant 0 : i32
    %1 = arith.cmpi eq, %c16_i32, %c0_i32 : i32
    %c1_i32 = arith.constant 1 : i32
    %2 = arith.select %1, %c1_i32, %c16_i32 : i32
    %3 = vector.broadcast %2 : i32 to vector<16x1xi32>
    %4 = arith.remsi %0, %3 : vector<16x1xi32>
    %c0_i32_0 = arith.constant 0 : i32
    %5 = vector.broadcast %c0_i32_0 : i32 to vector<16x1xi32>
    %6 = arith.cmpi ne, %4, %5 : vector<16x1xi32>
    %c0_i32_1 = arith.constant 0 : i32
    %7 = vector.broadcast %c0_i32_1 : i32 to vector<16x1xi32>
    %8 = arith.cmpi slt, %4, %7 : vector<16x1xi32>
    %c0_i32_2 = arith.constant 0 : i32
    %9 = arith.cmpi slt, %2, %c0_i32_2 : i32
    %10 = vector.broadcast %9 : i1 to vector<16x1xi1>
    %11 = vector.broadcast %10 : vector<16x1xi1> to vector<16x1xi1>
    %12 = arith.xori %8, %11 : vector<16x1xi1>
    %13 = arith.andi %12, %6 : vector<16x1xi1>
    %14 = vector.broadcast %2 : i32 to vector<16x1xi32>
    %15 = arith.addi %4, %14 : vector<16x1xi32>
    %16 = arith.select %13, %15, %4 : vector<16x1xi1>, vector<16x1xi32>
    %c0_i32_3 = arith.constant 0 : i32
    %17 = vector.broadcast %c0_i32_3 : i32 to vector<16x1xi32>
    %18 = arith.cmpi ne, %16, %17 : vector<16x1xi32>
    %19 = arith.extui %18 : vector<16x1xi1> to vector<16x1xi32>
    %20 = arith.sitofp %19 : vector<16x1xi32> to vector<16x1xf32>
    %c16_i32_4 = arith.constant 16 : i32
    %c0_i32_5 = arith.constant 0 : i32
    %21 = arith.cmpi eq, %c16_i32_4, %c0_i32_5 : i32
    %c1_i32_6 = arith.constant 1 : i32
    %22 = arith.select %21, %c1_i32_6, %c16_i32_4 : i32
    %23 = vector.broadcast %22 : i32 to vector<16x1xi32>
    %24 = arith.remsi %0, %23 : vector<16x1xi32>
    %c0_i32_7 = arith.constant 0 : i32
    %25 = vector.broadcast %c0_i32_7 : i32 to vector<16x1xi32>
    %26 = arith.cmpi ne, %24, %25 : vector<16x1xi32>
    %c0_i32_8 = arith.constant 0 : i32
    %27 = vector.broadcast %c0_i32_8 : i32 to vector<16x1xi32>
    %28 = arith.cmpi slt, %24, %27 : vector<16x1xi32>
    %c0_i32_9 = arith.constant 0 : i32
    %29 = arith.cmpi slt, %22, %c0_i32_9 : i32
    %30 = vector.broadcast %29 : i1 to vector<16x1xi1>
    %31 = vector.broadcast %30 : vector<16x1xi1> to vector<16x1xi1>
    %32 = arith.xori %28, %31 : vector<16x1xi1>
    %33 = arith.andi %32, %26 : vector<16x1xi1>
    %34 = vector.broadcast %22 : i32 to vector<16x1xi32>
    %35 = arith.addi %24, %34 : vector<16x1xi32>
    %36 = arith.select %33, %35, %24 : vector<16x1xi1>, vector<16x1xi32>
    %c15_i32 = arith.constant 15 : i32
    %37 = vector.broadcast %c15_i32 : i32 to vector<16x1xi32>
    %38 = arith.cmpi ne, %36, %37 : vector<16x1xi32>
    %39 = arith.extui %38 : vector<16x1xi1> to vector<16x1xi32>
    %40 = arith.sitofp %39 : vector<16x1xi32> to vector<16x1xf32>
    %c0 = arith.constant 0 : index
    %c0_10 = arith.constant 0 : index
    %41 = vector.load %arg1[%c0, %c0_10] : memref<16x256xf32, #tpu.memory_space<vmem>>, vector<16x256xf32>
    %c0_11 = arith.constant 0 : index
    %c0_12 = arith.constant 0 : index
    %42 = vector.load %arg2[%c0_11, %c0_12] : memref<1x256xf32, #tpu.memory_space<vmem>>, vector<1x256xf32>
    %43 = vector.broadcast %42 : vector<1x256xf32> to vector<16x256xf32>
    %44 = arith.mulf %41, %43 : vector<16x256xf32>
    %c0_13 = arith.constant 0 : index
    %c0_14 = arith.constant 0 : index
    %45 = vector.load %arg3[%c0_13, %c0_14] : memref<1x256xf32, #tpu.memory_space<vmem>>, vector<1x256xf32>
    %46 = vector.broadcast %45 : vector<1x256xf32> to vector<16x256xf32>
    %47 = arith.addf %44, %46 : vector<16x256xf32>
    %cst = arith.constant 0.000000e+00 : f32
    %48 = vector.broadcast %cst : f32 to vector<16x256xf32>
    %49 = arith.maximumf %47, %48 : vector<16x256xf32>
    %c1_i32_15 = arith.constant 1 : i32
    %50 = tpu.dynamic_rotate %49 by %c1_i32_15 dim 0 : vector<16x256xf32>, i32 -> vector<16x256xf32>
    %51 = vector.broadcast %20 : vector<16x1xf32> to vector<16x256xf32>
    %52 = arith.mulf %50, %51 : vector<16x256xf32>
    %c15_i32_16 = arith.constant 15 : i32
    %53 = tpu.dynamic_rotate %49 by %c15_i32_16 dim 0 : vector<16x256xf32>, i32 -> vector<16x256xf32>
    %54 = vector.broadcast %40 : vector<16x1xf32> to vector<16x256xf32>
    %55 = arith.mulf %53, %54 : vector<16x256xf32>
    %56 = arith.truncf %52 : vector<16x256xf32> to vector<16x256xbf16>
    %c0_17 = arith.constant 0 : index
    %c0_18 = arith.constant 0 : index
    %c0_19 = arith.constant 0 : index
    %57 = vector.load %arg4[%c0_17, %c0_18, %c0_19] : memref<3x256x256xbf16, #tpu.memory_space<vmem>>, vector<1x256x256xbf16>
    %58 = vector.shape_cast %57 : vector<1x256x256xbf16> to vector<256x256xbf16>
    %cst_20 = arith.constant dense<0.000000e+00> : vector<16x256xf32>
    %59 = tpu.matmul %56, %58, %cst_20 {dimension_numbers = #tpu.dot_dimension_numbers<[1], [0], [0], [1], [0, 0, 1, 1], [], []>} : vector<16x256xbf16>, vector<256x256xbf16>, vector<16x256xf32> -> vector<16x256xf32>
    %60 = arith.truncf %49 : vector<16x256xf32> to vector<16x256xbf16>
    %c1 = arith.constant 1 : index
    %c0_21 = arith.constant 0 : index
    %c0_22 = arith.constant 0 : index
    %61 = vector.load %arg4[%c1, %c0_21, %c0_22] : memref<3x256x256xbf16, #tpu.memory_space<vmem>>, vector<1x256x256xbf16>
    %62 = vector.shape_cast %61 : vector<1x256x256xbf16> to vector<256x256xbf16>
    %cst_23 = arith.constant dense<0.000000e+00> : vector<16x256xf32>
    %63 = tpu.matmul %60, %62, %cst_23 {dimension_numbers = #tpu.dot_dimension_numbers<[1], [0], [0], [1], [0, 0, 1, 1], [], []>} : vector<16x256xbf16>, vector<256x256xbf16>, vector<16x256xf32> -> vector<16x256xf32>
    %64 = arith.addf %59, %63 : vector<16x256xf32>
    %65 = arith.truncf %55 : vector<16x256xf32> to vector<16x256xbf16>
    %c2 = arith.constant 2 : index
    %c0_24 = arith.constant 0 : index
    %c0_25 = arith.constant 0 : index
    %66 = vector.load %arg4[%c2, %c0_24, %c0_25] : memref<3x256x256xbf16, #tpu.memory_space<vmem>>, vector<1x256x256xbf16>
    %67 = vector.shape_cast %66 : vector<1x256x256xbf16> to vector<256x256xbf16>
    %cst_26 = arith.constant dense<0.000000e+00> : vector<16x256xf32>
    %68 = tpu.matmul %65, %67, %cst_26 {dimension_numbers = #tpu.dot_dimension_numbers<[1], [0], [0], [1], [0, 0, 1, 1], [], []>} : vector<16x256xbf16>, vector<256x256xbf16>, vector<16x256xf32> -> vector<16x256xf32>
    %69 = arith.addf %64, %68 : vector<16x256xf32>
    %c0_27 = arith.constant 0 : index
    %c0_28 = arith.constant 0 : index
    %70 = vector.load %arg5[%c0_27, %c0_28] : memref<1x256xf32, #tpu.memory_space<vmem>>, vector<1x256xf32>
    %71 = vector.broadcast %70 : vector<1x256xf32> to vector<16x256xf32>
    %72 = arith.mulf %69, %71 : vector<16x256xf32>
    %c0_29 = arith.constant 0 : index
    %c0_30 = arith.constant 0 : index
    %73 = vector.load %arg6[%c0_29, %c0_30] : memref<1x256xf32, #tpu.memory_space<vmem>>, vector<1x256xf32>
    %74 = vector.broadcast %73 : vector<1x256xf32> to vector<16x256xf32>
    %75 = arith.addf %72, %74 : vector<16x256xf32>
    %cst_31 = arith.constant 0.000000e+00 : f32
    %76 = vector.broadcast %cst_31 : f32 to vector<16x256xf32>
    %77 = arith.maximumf %75, %76 : vector<16x256xf32>
    %c1_i32_32 = arith.constant 1 : i32
    %78 = tpu.dynamic_rotate %77 by %c1_i32_32 dim 0 : vector<16x256xf32>, i32 -> vector<16x256xf32>
    %79 = vector.broadcast %20 : vector<16x1xf32> to vector<16x256xf32>
    %80 = arith.mulf %78, %79 : vector<16x256xf32>
    %c15_i32_33 = arith.constant 15 : i32
    %81 = tpu.dynamic_rotate %77 by %c15_i32_33 dim 0 : vector<16x256xf32>, i32 -> vector<16x256xf32>
    %82 = vector.broadcast %40 : vector<16x1xf32> to vector<16x256xf32>
    %83 = arith.mulf %81, %82 : vector<16x256xf32>
    %84 = arith.truncf %80 : vector<16x256xf32> to vector<16x256xbf16>
    %c0_34 = arith.constant 0 : index
    %c0_35 = arith.constant 0 : index
    %c0_36 = arith.constant 0 : index
    %85 = vector.load %arg7[%c0_34, %c0_35, %c0_36] : memref<3x256x256xbf16, #tpu.memory_space<vmem>>, vector<1x256x256xbf16>
    %86 = vector.shape_cast %85 : vector<1x256x256xbf16> to vector<256x256xbf16>
    %cst_37 = arith.constant dense<0.000000e+00> : vector<16x256xf32>
    %87 = tpu.matmul %84, %86, %cst_37 {dimension_numbers = #tpu.dot_dimension_numbers<[1], [0], [0], [1], [0, 0, 1, 1], [], []>} : vector<16x256xbf16>, vector<256x256xbf16>, vector<16x256xf32> -> vector<16x256xf32>
    %88 = arith.truncf %77 : vector<16x256xf32> to vector<16x256xbf16>
    %c1_38 = arith.constant 1 : index
    %c0_39 = arith.constant 0 : index
    %c0_40 = arith.constant 0 : index
    %89 = vector.load %arg7[%c1_38, %c0_39, %c0_40] : memref<3x256x256xbf16, #tpu.memory_space<vmem>>, vector<1x256x256xbf16>
    %90 = vector.shape_cast %89 : vector<1x256x256xbf16> to vector<256x256xbf16>
    %cst_41 = arith.constant dense<0.000000e+00> : vector<16x256xf32>
    %91 = tpu.matmul %88, %90, %cst_41 {dimension_numbers = #tpu.dot_dimension_numbers<[1], [0], [0], [1], [0, 0, 1, 1], [], []>} : vector<16x256xbf16>, vector<256x256xbf16>, vector<16x256xf32> -> vector<16x256xf32>
    %92 = arith.addf %87, %91 : vector<16x256xf32>
    %93 = arith.truncf %83 : vector<16x256xf32> to vector<16x256xbf16>
    %c2_42 = arith.constant 2 : index
    %c0_43 = arith.constant 0 : index
    %c0_44 = arith.constant 0 : index
    %94 = vector.load %arg7[%c2_42, %c0_43, %c0_44] : memref<3x256x256xbf16, #tpu.memory_space<vmem>>, vector<1x256x256xbf16>
    %95 = vector.shape_cast %94 : vector<1x256x256xbf16> to vector<256x256xbf16>
    %cst_45 = arith.constant dense<0.000000e+00> : vector<16x256xf32>
    %96 = tpu.matmul %93, %95, %cst_45 {dimension_numbers = #tpu.dot_dimension_numbers<[1], [0], [0], [1], [0, 0, 1, 1], [], []>} : vector<16x256xbf16>, vector<256x256xbf16>, vector<16x256xf32> -> vector<16x256xf32>
    %97 = arith.addf %92, %96 : vector<16x256xf32>
    %c0_46 = arith.constant 0 : index
    %c0_47 = arith.constant 0 : index
    %98 = vector.load %arg1[%c0_46, %c0_47] : memref<16x256xf32, #tpu.memory_space<vmem>>, vector<16x256xf32>
    %99 = arith.addf %98, %97 : vector<16x256xf32>
    %c0_48 = arith.constant 0 : index
    %c0_49 = arith.constant 0 : index
    %100 = vector.load %arg8[%c0_48, %c0_49] : memref<16x256xf32, #tpu.memory_space<vmem>>, vector<16x256xf32>
    tpu.vector_store %arg8[%c0_48, %c0_49], %99 {strides = array<i32>} : memref<16x256xf32, #tpu.memory_space<vmem>>, vector<16x256xf32>,
    return
  }
  func.func @transform_0(%arg0: i32) -> (i32, i32) {
    %c0_i32 = arith.constant 0 : i32
    %c0_i32_0 = arith.constant 0 : i32
    return %arg0, %c0_i32 : i32, i32
  }
  func.func @transform_1(%arg0: i32) -> (i32, i32) {
    %c0_i32 = arith.constant 0 : i32
    %c0_i32_0 = arith.constant 0 : i32
    %c0_i32_1 = arith.constant 0 : i32
    return %c0_i32, %c0_i32_0 : i32, i32
  }
  func.func @transform_2(%arg0: i32) -> (i32, i32) {
    %c0_i32 = arith.constant 0 : i32
    %c0_i32_0 = arith.constant 0 : i32
    %c0_i32_1 = arith.constant 0 : i32
    return %c0_i32, %c0_i32_0 : i32, i32
  }
  func.func @transform_3(%arg0: i32) -> (i32, i32, i32) {
    %c0_i32 = arith.constant 0 : i32
    %c0_i32_0 = arith.constant 0 : i32
    %c0_i32_1 = arith.constant 0 : i32
    %c0_i32_2 = arith.constant 0 : i32
    return %c0_i32, %c0_i32_0, %c0_i32_1 : i32, i32, i32
  }
  func.func @transform_4(%arg0: i32) -> (i32, i32) {
    %c0_i32 = arith.constant 0 : i32
    %c0_i32_0 = arith.constant 0 : i32
    %c0_i32_1 = arith.constant 0 : i32
    return %c0_i32, %c0_i32_0 : i32, i32
  }
  func.func @transform_5(%arg0: i32) -> (i32, i32) {
    %c0_i32 = arith.constant 0 : i32
    %c0_i32_0 = arith.constant 0 : i32
    %c0_i32_1 = arith.constant 0 : i32
    return %c0_i32, %c0_i32_0 : i32, i32
  }
  func.func @transform_6(%arg0: i32) -> (i32, i32, i32) {
    %c0_i32 = arith.constant 0 : i32
    %c0_i32_0 = arith.constant 0 : i32
    %c0_i32_1 = arith.constant 0 : i32
    %c0_i32_2 = arith.constant 0 : i32
    return %c0_i32, %c0_i32_0, %c0_i32_1 : i32, i32, i32
  }
  func.func @transform_7(%arg0: i32) -> (i32, i32) {
    %c0_i32 = arith.constant 0 : i32
    %c0_i32_0 = arith.constant 0 : i32
    return %arg0, %c0_i32 : i32, i32
  }
}

</mosaic_0001>

<bundles_post_ra>
// kernel: tpu_custom_call.1
= control target key start
LH: loop header
LB: loop body
LE: loop exit
PB: predicated region body
PF: predicated region fallthrough
CT: control target
= control target key end

     0   :  { %s3211_s0 = inlined_call_operand.hbm [shape: f32[32,256], index: 0, kind: input, shape index: {}]   ;;  %s3212_s1 = inlined_call_operand.hbm [shape: f32[1,256], index: 1, kind: input, shape index: {}]   ;;  %s3213_s2 = inlined_call_operand.vmem [shape: f32[1,256], index: 2, kind: input, shape index: {}]   ;;  %s3214_s3 = inlined_call_operand.hbm [shape: bf16[3,256,256], index: 3, kind: input, shape index: {}]   ;;  %s3215_s4 = inlined_call_operand.vmem [shape: f32[1,256], index: 4, kind: input, shape index: {}]   ;;  %s3216_s5 = inlined_call_operand.vmem [shape: f32[1,256], index: 5, kind: input, shape index: {}]   ;;  %s3217_s6 = inlined_call_operand.hbm [shape: bf16[3,256,256], index: 6, kind: input, shape index: {}]   ;;  %s3218_s7 = inlined_call_operand.hbm [shape: f32[32,256], index: 7, kind: output, shape index: {}]  }
   0x1   :  { %3223 = sst [smem:[#allocation15_spill]] %s3212_s1 }
   0x2   :  { %12 = vsyncpa [#allocation3], 0 }
   0x3   :  { %14 = vsyncpa [#allocation3 + $0x1], 0 }
   0x4   :  { %15 = vsyncpa [#allocation6], 0 }
   0x5   :  { %16 = vsyncpa [#allocation9], 0 }
   0x6   :  { %17 = vsyncpa [#allocation4], 0 }
   0x7   :  { %19 = vsyncpa [#allocation4 + $0x1], 0  ;;  %s2894_s24 = smov 0   ;;  %s2896_s25 = smov 0  }
   0x8   :  { %s2898_s26 = smov 0   ;;  %s2900_s27 = smov 0  }
   0x9 LB: > { %s2915_s28 = sadd.s32 4294967295, %s2840_s27   ;;  %s2066_s29 = sadd.s32 4294967294, %s2840_s27   ;;  %s2840_s27 = sphi %s2900_s27, %s3246_s27   ;;  %s2836_s26 = sphi %s2898_s26, %s3245_s26   ;;  %s2832_s25 = sphi %s2896_s25, %s3244_s25   ;;  %s2828_s24 = sphi %s2894_s24, %s3243_s24  }
   0xa   : > { %p45_p0 = scmp.ne.s32.totalorder %s2832_s25, %s2828_s24  ;;  %p3219_p1 = scmp.eq.s32.totalorder %s2915_s28, 0 }
   0xb   : > { %p201_p3 = scmp.eq.s32.totalorder %s2066_s29, 1  ;;  %p2067_p5 = scmp.ge.s32.totalorder %s2840_s27, 1 }
   0xc   : > { %p2924_p4 = por %p3219_p1, %p45_p0  ;;  %p208_p7 = scmp.lt.s32.totalorder %s2840_s27, 3 }
   0xd   : > { %p2929_p6 = por %p201_p3, %p45_p0  ;;  %s2842_s10 = smov [#allocation5]  }
   0xe   : > { %s3224_s30 = scalar_select %p2924_p4, 1, 0 }
   0xf   : > { %s3225_s8 = scalar_select %p2929_p6, 1, 0 }
  0x10   : > { %p2934_p8 = pnand %p2067_p5, %p208_p7  ;;  %s221_s11 = sshll.u32 %s2842_s10, 4  ;;  %s222_s11 = int_to_ptr.vmem [resolvable:$true] %s221_s11 }
  0x11   : > { %s2843_s12 = smov [#allocation7]   ;;  %s2844_s15 = smov [#allocation8]  }
  0x12   : > { %s3226_s9 = scalar_select %p2934_p8, 1, 0 }
  0x13   : > { %p2302_p10 = pneg %p2934_p8  ;;  %s234_s13 = sshll.u32 %s2843_s12, 4  ;;  %s235_s13 = int_to_ptr.vmem [resolvable:$true] %s234_s13 }
  0x14   : > { %s253_s16 = sshll.u32 %s2844_s15, 4  ;;  %s2673_s17 = scalar_lea.vmem %s222_s11, 32  ;;  %s254_s16 = int_to_ptr.vmem [resolvable:$true] %s253_s16 }
  0x15   : > { %p2943_p11 = pnand %p2302_p10, %p3219_p1  ;;  %p2674_p13 = scmp.ne.s32.totalorder %s222_s11, %s2673_s17 }
  0x16   : > { %p2681_p5 = scmp.lt.s32.totalorder %s222_s11, %s222_s11  ;;  %p2682_p7 = scmp.lt.s32.totalorder %s2673_s17, %s2673_s17 }
  0x17   : > { %p2664_p12 = pneg %p2943_p11 }
  0x18   : > { %p2683_p9 = por %p2682_p7, %p2681_p5 }
  0x19   : > { %p2676_p0 = pnand %p2674_p13, %p2664_p12 }
  0x1b   : > { %p2677_p3 = pneg %p2676_p0 }
  0x1d   : > { %p2684_p10 = pnand %p2683_p9, %p2677_p3 }
  0x1f   : > { %2687 = shalt.err (!%p2684_p10)
}
  0x20   : > { %s3228_s1 = sld [smem:[#allocation15_spill]]  ;;  %s2699_s20 = scalar_lea.vmem %s235_s13, 12288 }
  0x21   : > { %p2700_p1 = scmp.ne.s32.totalorder %s235_s13, %s2699_s20  ;;  %p2707_p13 = scmp.lt.s32.totalorder %s235_s13, %s235_s13 }
  0x22   : > { %p2708_p0 = scmp.lt.s32.totalorder %s2699_s20, %s2699_s20 }
  0x23   : > { %p2702_p2 = pnand %p2700_p1, %p2664_p12 }
  0x24   : > { %p2709_p4 = por %p2708_p0, %p2707_p13 }
  0x25   : > { %p2703_p6 = pneg %p2702_p2 }
  0x26   : > { %2305 = dma.hbm_to_vmem [thread:$0]  (!%p2943_p11), %s3228_s1, 32, %s222_s11, [#allocation6]  }
  0x27   : > { %p2710_p8 = pnand %p2709_p4, %p2703_p6 }
  0x29   : > { %2713 = shalt.err (!%p2710_p8)
}
  0x2a   : > { %s2845_s21 = smov 128   ;;  %s2846_s22 = smov 8  }
  0x2b   : > { %2308 = dma.hbm_to_vmem [thread:$0]  (!%p2943_p11), %s3214_s3, 12288, %s235_s13, [#allocation6], %s2845_s21, %s2845_s21, %s2846_s22  }
  0x2c   : > { %s2725_s10 = scalar_lea.vmem %s254_s16, 12288  ;;  %p2733_p3 = scmp.lt.s32.totalorder %s254_s16, %s254_s16 }
  0x2d   : > { %p2726_p9 = scmp.ne.s32.totalorder %s254_s16, %s2725_s10  ;;  %p2734_p5 = scmp.lt.s32.totalorder %s2725_s10, %s2725_s10 }
  0x2f   : > { %p2728_p1 = pnand %p2726_p9, %p2664_p12  ;;  %p2735_p4 = por %p2734_p5, %p2733_p3 }
  0x31   : > { %p2729_p2 = pneg %p2728_p1 }
  0x33   : > { %p2736_p6 = pnand %p2735_p4, %p2729_p2 }
  0x35   : > { %2739 = shalt.err (!%p2736_p6)
}
  0x36   : > { %2311 = dma.hbm_to_vmem [thread:$0]  (!%p2943_p11), %s3217_s6, 12288, %s254_s16, [#allocation9], %s2845_s21, %s2845_s21, %s2846_s22  }
  0x37   : > { %s2974_s13 = sadd.s32 1, %s2840_s27   ;;  %s32_s14 = sadd.s32 1, %s2836_s26 }
  0x38   : > { %s29_s15 = ssub.s32 %s2840_s27, %s2974_s13  ;;  %p39_p12 = scmp.ne.s32.totalorder %s2836_s26, %s2832_s25 }
  0x39   : > { %p30_p8 = scmp.eq.s32.totalorder %s29_s15, 0  ;;  %p40_p7 = scmp.eq.s32.totalorder %s2840_s27, 0 }
  0x3a   : > { %p2323_p10 = scmp.lt.s32.totalorder %s2840_s27, 2  ;;  %p3229_p0 = scmp.eq.s32.totalorder %s2915_s28, 1 }
  0x3b   : > { %s2984_s17 = scalar_select %p30_p8, %s2836_s26, %s32_s14  }
  0x3c   : > { %p41_p13 = por %p40_p7, %p39_p12  ;;  %p2988_p9 = por %p3229_p0, %p39_p12 }
  0x3d   : > { %s267_s19 = sand.u32 1, %s2836_s26   ;;  %s2283_s20 = sshll.u32 %s2840_s27, 9 }
  0x3e   : > { %s3230_s18 = scalar_select %p2988_p9, 1, 0 }
  0x3f   : > { %s2072_s16 = sshll.u32 %s267_s19, 5  ;;  %s2997_s23 = scalar_lea.hbm %s3211_s0, %s2283_s20 }
  0x40   : > { %s271_s29 = scalar_lea.vmem [#allocation2], %s2072_s16  ;;  %p2999_p11 = pnand %p2323_p10, %p41_p13 }
  0x41   : > { %s279_s10 = sshll.u32 %s271_s29, 4  ;;  %s3005_s12 = scalar_lea.sflag [#allocation3], %s267_s19  ;;  %s3003_s10 = int_to_ptr.vmem [resolvable:$true] %s279_s10 }
  0x42   : > { %s2740_s15 = scalar_lea.hbm %s2997_s23, 512  ;;  %p2742_p2 = pneg %p2999_p11 }
  0x43   : > { %p2741_p1 = scmp.ne.s32.totalorder %s2997_s23, %s2740_s15  ;;  %s2745_s16 = scalar_lea.hbm %s3211_s0, 1024 }
  0x44   : > { %p2746_p4 = scmp.lt.s32.totalorder %s2997_s23, %s3211_s0  ;;  %p2747_p6 = scmp.lt.s32.totalorder %s2745_s16, %s2740_s15 }
  0x45   : > { %p2743_p3 = pnand %p2742_p2, %p2741_p1 }
  0x46   : > { %p2748_p8 = por %p2747_p6, %p2746_p4 }
  0x47   : > { %p2744_p5 = pneg %p2743_p3 }
  0x49   : > { %p2749_p12 = pnand %p2748_p8, %p2744_p5 }
  0x4b   : > { %2752 = shalt.err (!%p2749_p12)
}
  0x4c   : > { %s2753_s19 = scalar_lea.vmem %s3003_s10, 512  ;;  %s2847_s29 = smov [#allocation2]  }
  0x4d   : > { %p2754_p7 = scmp.ne.s32.totalorder %s3003_s10, %s2753_s19  ;;  %s2758_s1 = sshll.u32 %s2847_s29, 4  ;;  %s2759_s1 = int_to_ptr.vmem [resolvable:$false] %s2758_s1 }
  0x4e   : > { %s2760_s14 = scalar_lea.vmem %s2759_s1, 1024  ;;  %p2761_p0 = scmp.lt.s32.totalorder %s3003_s10, %s2759_s1 }
  0x4f   : > { %p2756_p10 = pnand %p2754_p7, %p2742_p2  ;;  %p2762_p1 = scmp.lt.s32.totalorder %s2760_s14, %s2753_s19 }
  0x51   : > { %p2757_p13 = pneg %p2756_p10  ;;  %p2763_p3 = por %p2762_p1, %p2761_p0 }
  0x53   : > { %p2764_p9 = pnand %p2763_p3, %p2757_p13 }
  0x55   : > { %2767 = shalt.err (!%p2764_p9)
}
  0x56   : > { %s2848_s15 = smov 256   ;;  %s2849_s20 = smov 16  }
  0x57   : > { %2315 = dma.hbm_to_vmem [thread:$0]  (!%p2999_p11), %s2997_s23, 512, %s3003_s10, %s3005_s12, %s2848_s15, %s2848_s15, %s2849_s20  }
  0x58   : > { %p3232_p2 = scmp.ne.s32.totalorder %s3226_s9, 0 }
  0x59   : > { %s3029_s16 = sand.u32 (!%p3232_p2), 1, %s2832_s25   ;;  %p3233_p9 = scmp.ne.s32.totalorder (!%p3232_p2), %s3224_s30, 0 }
  0x5a   : > { %291 = sbr.rel (%p3232_p2) target bundleno = 723 (0x2d3), region = 48  ;;  %s2077_s1 = sshll.u32 (!%p3232_p2), %s3029_s16, 5 }
  0x5b   : > { %s294_s21 = scalar_lea.sflag (!%p3232_p2), [#allocation3], %s3029_s16  ;;  %s3035_s22 = scalar_lea.vmem (!%p3232_p2), [#allocation2], %s2077_s1 }
  0x5f   : > { %2811 = dma.done.wait (%p3233_p9), %s294_s21, 512  }
  0x60   : > { %2813 = vsyncadd (%p3233_p9), %s294_s21, 4294966784  ;;  %p3234_p11 = scmp.eq.s32.totalorder %s2915_s28, 0 }
  0x62   : > { %2815 = dma.done.wait (%p3234_p11), [#allocation6], 12320   ;;  %p3235_p5 = pmov %p3234_p11 }
  0x64   : > { %2817 = vsyncadd (%p3235_p5), [#allocation6], 4294954976  ;;  %p3236_p4 = pmov %p3235_p5 }
  0x66   : > { %2819 = dma.done.wait (%p3236_p4), [#allocation9], 12288   ;;  %p3237_p6 = pmov %p3236_p4 }
  0x67   : > { %v2370_v0 = vld [vmem:[#allocation7 + $0x174] ss:$8 sps:$4 sm:$0xff]   ;;  %v2374_v2 = vld [vmem:[#allocation7 + $0x170] ss:$8 sps:$4 sm:$0xff]   ;;  %v2376_v4 = vld [vmem:[#allocation7 + $0x164] ss:$8 sps:$4 sm:$0xff]   ;;  %v342_v37 = vlaneseq }
  0x68   : > { %2821 = vsyncadd (%p3237_p6), [#allocation9], 4294955008  ;;  %v2372_v1 = vld [vmem:[#allocation7 + $0x74] ss:$8 sps:$4 sm:$0xff]   ;;  %676 = vmatprep.subr.bf16.mxu0 %v2370_v0  ;;  %v2375_v3 = vld [vmem:[#allocation7 + $0x70] ss:$8 sps:$4 sm:$0xff]  }
  0x69   : > { %879 = vmatprep.subr.bf16.mxu1 %v2372_v1  ;;  %677 = vmatpush1.bf16.msra.mxu0 %v2374_v2  ;;  %v2378_v5 = vld [vmem:[#allocation7 + $0x64] ss:$8 sps:$4 sm:$0xff]   ;;  %v2380_v6 = vld [vmem:[#allocation7 + $0x160] ss:$8 sps:$4 sm:$0xff]   ;;  %v2382_v8 = vld [vmem:[#allocation7 + $0x154] ss:$8 sps:$4 sm:$0xff]  }
  0x6a   : > { %880 = vmatpush1.bf16.msra.mxu1 %v2375_v3  ;;  %678 = vmatprep.subr.bf16.mxu0 %v2376_v4  ;;  %v2381_v7 = vld [vmem:[#allocation7 + $0x60] ss:$8 sps:$4 sm:$0xff]   ;;  %v2384_v9 = vld [vmem:[#allocation7 + $0x54] ss:$8 sps:$4 sm:$0xff]   ;;  %v2386_v10 = vld [vmem:[#allocation7 + $0x150] ss:$8 sps:$4 sm:$0xff]  }
  0x6b   : > { %881 = vmatprep.subr.bf16.mxu1 %v2378_v5  ;;  %v2387_v11 = vld [vmem:[#allocation7 + $0x50] ss:$8 sps:$4 sm:$0xff]   ;;  %v2388_v12 = vld [vmem:[#allocation7 + $0x144] ss:$8 sps:$4 sm:$0xff]   ;;  %v2392_v14 = vld [vmem:[#allocation7 + $0x140] ss:$8 sps:$4 sm:$0xff]  }
  0x6c   : > { %v2390_v13 = vld [vmem:[#allocation7 + $0x44] ss:$8 sps:$4 sm:$0xff]   ;;  %v2393_v15 = vld [vmem:[#allocation7 + $0x40] ss:$8 sps:$4 sm:$0xff]   ;;  %v2394_v16 = vld [vmem:[#allocation7 + $0x134] ss:$8 sps:$4 sm:$0xff]  }
  0x6d   : > { %679 = vmatpush1.bf16.msra.mxu0 %v2380_v6  ;;  %v2396_v17 = vld [vmem:[#allocation7 + $0x34] ss:$8 sps:$4 sm:$0xff]   ;;  %v2398_v18 = vld [vmem:[#allocation7 + $0x130] ss:$8 sps:$4 sm:$0xff]   ;;  %v2400_v20 = vld [vmem:[#allocation7 + $0x124] ss:$8 sps:$4 sm:$0xff]  }
  0x6e   : > { %882 = vmatpush1.bf16.msra.mxu1 %v2381_v7  ;;  %680 = vmatprep.subr.bf16.mxu0 %v2382_v8  ;;  %v2399_v19 = vld [vmem:[#allocation7 + $0x30] ss:$8 sps:$4 sm:$0xff]   ;;  %v2402_v21 = vld [vmem:[#allocation7 + $0x24] ss:$8 sps:$4 sm:$0xff]   ;;  %v2404_v22 = vld [vmem:[#allocation7 + $0x120] ss:$8 sps:$4 sm:$0xff]  }
  0x6f   : > { %883 = vmatprep.subr.bf16.mxu1 %v2384_v9  ;;  %v2405_v23 = vld [vmem:[#allocation7 + $0x20] ss:$8 sps:$4 sm:$0xff]   ;;  %v2406_v24 = vld [vmem:[#allocation7 + $0x114] ss:$8 sps:$4 sm:$0xff]   ;;  %v2410_v26 = vld [vmem:[#allocation7 + $0x110] ss:$8 sps:$4 sm:$0xff]  }
  0x70   : > { %v2408_v25 = vld [vmem:[#allocation7 + $0x14] ss:$8 sps:$4 sm:$0xff]   ;;  %v2411_v27 = vld [vmem:[#allocation7 + $0x10] ss:$8 sps:$4 sm:$0xff]   ;;  %v2412_v28 = vld [vmem:[#allocation7 + $0x104] ss:$8 sps:$4 sm:$0xff]  }
  0x71   : > { %681 = vmatpush1.bf16.msra.mxu0 %v2386_v10  ;;  %v2414_v29 = vld [vmem:[#allocation7 + $0x4] ss:$8 sps:$4 sm:$0xff]   ;;  %v2416_v30 = vld [vmem:[#allocation7 + $0x100] ss:$8 sps:$4 sm:$0xff]   ;;  %v2418_v32 = vld [vmem:[#allocation7 + $0x1f4] ss:$8 sps:$4 sm:$0xff]  }
  0x72   : > { %884 = vmatpush1.bf16.msra.mxu1 %v2387_v11  ;;  %682 = vmatprep.subr.bf16.mxu0 %v2388_v12  ;;  %v2417_v31 = vld [vmem:[#allocation7] ss:$8 sps:$4 sm:$0xff]   ;;  %v2420_v33 = vld [vmem:[#allocation7 + $0xf4] ss:$8 sps:$4 sm:$0xff]   ;;  %v2422_v34 = vld [vmem:[#allocation7 + $0x1f0] ss:$8 sps:$4 sm:$0xff]  }
  0x73   : > { %885 = vmatprep.subr.bf16.mxu1 %v2390_v13  ;;  %v2423_v35 = vld [vmem:[#allocation7 + $0xf0] ss:$8 sps:$4 sm:$0xff]   ;;  %v2424_v36 = vld [vmem:[#allocation7 + $0x1e4] ss:$8 sps:$4 sm:$0xff]   ;;  %v2428_v39 = vld [vmem:[#allocation7 + $0x1e0] ss:$8 sps:$4 sm:$0xff]  }
  0x74   : > { %v2426_v38 = vld [vmem:[#allocation7 + $0xe4] ss:$8 sps:$4 sm:$0xff]   ;;  %v2429_v40 = vld [vmem:[#allocation7 + $0xe0] ss:$8 sps:$4 sm:$0xff]   ;;  %v2430_v41 = vld [vmem:[#allocation7 + $0x1d4] ss:$8 sps:$4 sm:$0xff]  }
  0x75   : > { %683 = vmatpush1.bf16.msra.mxu0 %v2392_v14  ;;  %v3049_v42 = vshrl.u32 %v342_v37, 7  ;;  %v2432_v43 = vld [vmem:[#allocation7 + $0xd4] ss:$8 sps:$4 sm:$0xff]   ;;  %v2434_v44 = vld [vmem:[#allocation7 + $0x1d0] ss:$8 sps:$4 sm:$0xff]   ;;  %v382_v52 = vld [vmem:[%s3035_s22 + $0x8] sm:$0xff] }
  0x76   : > { %886 = vmatpush1.bf16.msra.mxu1 %v2393_v15  ;;  %684 = vmatprep.subr.bf16.mxu0 %v2394_v16  ;;  %v2435_v45 = vld [vmem:[#allocation7 + $0xd0] ss:$8 sps:$4 sm:$0xff]   ;;  %v2436_v46 = vld [vmem:[#allocation7 + $0x1c4] ss:$8 sps:$4 sm:$0xff]   ;;  %v2440_v50 = vld [vmem:[#allocation7 + $0x1c0] ss:$8 sps:$4 sm:$0xff]  }
  0x77   : > { %887 = vmatprep.subr.bf16.mxu1 %v2396_v17  ;;  %v3052_v47 = vsub.s32 0, %v3049_v42  ;;  %v3055_v48 = vsub.s32 1, %v3049_v42  ;;  %v2438_v49 = vld [vmem:[#allocation7 + $0xc4] ss:$8 sps:$4 sm:$0xff]   ;;  %v2441_v51 = vld [vmem:[#allocation7 + $0xc0] ss:$8 sps:$4 sm:$0xff]  }
  0x78   : > { %v384_v53 = vld [vmem:[%s3035_s22 + $0x18] sm:$0xff]  ;;  %v385_v54 = vld [vmem:[#allocation5] sm:$0x3]  ;;  %v344_v59 = vadd.s32 8, %v3049_v42  ;;  %v383_v61 = vld [vmem:[%s3035_s22 + $0x10] sm:$0xff]  ;;  %v349_v1 = vand.u32 15, %v3049_v42 }
  0x79   : > { %685 = vmatpush1.bf16.msra.mxu0 %v2398_v18  ;;  %v401_v55 = vld [vmem:[%s3213_s2] sm:$0x3]  ;;  %v390_v56 = vrot.slane %v385_v54, %v3052_v47  ;;  %v394_v57 = vrot.slane %v385_v54, %v3055_v48  ;;  %vm425_vm0 = vcmp.lt.s32.totalorder %v3049_v42, 1  ;;  %v2446_v6 = vld [vmem:[#allocation7 + $0x1b0] ss:$8 sps:$4 sm:$0xff]   ;;  %vm438_vm3 = vcmp.lt.s32.totalorder %v3049_v42, 7 }
  0x7a   : > { %888 = vmatpush1.bf16.msra.mxu1 %v2399_v19  ;;  %686 = vmatprep.subr.bf16.mxu0 %v2400_v20  ;;  %v406_v58 = vrot.slane %v401_v55, %v3052_v47  ;;  %v381_v60 = vld [vmem:[%s3035_s22] sm:$0xff]  ;;  %v410_v0 = vrot.slane %v401_v55, %v3055_v48  ;;  %v2447_v7 = vld [vmem:[#allocation7 + $0xb0] ss:$8 sps:$4 sm:$0xff]   ;;  %v356_v10 = vand.u32 15, %v344_v59  ;;  %vm369_vm1 = vcmp.ne.s32.totalorder %v349_v1, 0  ;;  %s339_s19 = scalar_lea.vmem [#allocation10], %s2077_s1 }
  0x7b   : > { %889 = vmatprep.subr.bf16.mxu1 %v2402_v21  ;;  %v2442_v62 = vld [vmem:[#allocation7 + $0x1b4] ss:$8 sps:$4 sm:$0xff]   ;;  %v398_v2 = vmul.f32 %v394_v57, %v382_v52  ;;  %v400_v3 = vmul.f32 %v394_v57, %v384_v53  ;;  %v397_v4 = vmul.f32 %v390_v56, %v381_v60  ;;  %v399_v5 = vmul.f32 %v390_v56, %v383_v61  ;;  %v2448_v12 = vld [vmem:[#allocation7 + $0x1a4] ss:$8 sps:$4 sm:$0xff]   ;;  %v2452_v15 = vld [vmem:[#allocation7 + $0x1a0] ss:$8 sps:$4 sm:$0xff]  }
  0x7c   : > { %v2444_v63 = vld [vmem:[#allocation7 + $0xb4] ss:$8 sps:$4 sm:$0xff]   ;;  %v2450_v13 = vld [vmem:[#allocation7 + $0xa4] ss:$8 sps:$4 sm:$0xff]   ;;  %v2453_v19 = vld [vmem:[#allocation7 + $0xa0] ss:$8 sps:$4 sm:$0xff]  }
  0x7d   : > { %687 = vmatpush1.bf16.msra.mxu0 %v2404_v22  ;;  %v414_v8 = vadd.f32 %v410_v0, %v398_v2  ;;  %v416_v9 = vadd.f32 %v410_v0, %v400_v3  ;;  %v413_v11 = vadd.f32 %v406_v58, %v397_v4  ;;  %v415_v14 = vadd.f32 %v406_v58, %v399_v5  ;;  %v2454_v20 = vld [vmem:[#allocation7 + $0x194] ss:$8 sps:$4 sm:$0xff]   ;;  %v2465_v53 = vld [vmem:[#allocation7 + $0x80] ss:$8 sps:$4 sm:$0xff]   ;;  %v2471_v0 = vld [vmem:[#allocation7 + $0x264] ss:$8 sps:$4 sm:$0xff]  }
  0x7e   : > { %890 = vmatpush1.bf16.msra.mxu1 %v2405_v23  ;;  %688 = vmatprep.subr.bf16.mxu0 %v2406_v24  ;;  %v2456_v22 = vld [vmem:[#allocation7 + $0x94] ss:$8 sps:$4 sm:$0xff]   ;;  %vm3076_vm2 = vcmp.ne.s32.totalorder %v356_v10, 15  ;;  %v2469_v1 = vld [vmem:[#allocation7 + $0x260] ss:$8 sps:$4 sm:$0xff]   ;;  %s1964_s29 = sshll.u32 %s339_s19, 4  ;;  %s3161_s29 = int_to_ptr.vmem [resolvable:$true] %s1964_s29 }
  0x7f   : > { %891 = vmatprep.subr.bf16.mxu1 %v2408_v25  ;;  %v418_v16 = vmax.f32 %v414_v8, 0.0  ;;  %v420_v17 = vmax.f32 %v416_v9, 0.0  ;;  %v3071_v18 = vmax.f32 %v413_v11, 0.0  ;;  %v419_v21 = vmax.f32 %v415_v14, 0.0  ;;  %v2468_v57 = vld [vmem:[#allocation7 + $0x274] ss:$8 sps:$4 sm:$0xff]  }
  0x80   : > { %v2850_v25 = vmov 0.0   ;;  %v2474_v2 = vld [vmem:[#allocation7 + $0x254] ss:$8 sps:$4 sm:$0xff]   ;;  %v2472_v3 = vld [vmem:[#allocation7 + $0x250] ss:$8 sps:$4 sm:$0xff]   ;;  %s2285_s14 = sshll.u32 %s2915_s28, 9 }
  0x81   : > { %689 = vmatpush1.bf16.msra.mxu0 %v2410_v26  ;;  %v435_v23 = vrot.slane %v418_v16, 1  ;;  %v482_v24 = vpack.c.bf16 %v420_v17, %v418_v16  ;;  %v3073_v26 = vsel %vm369_vm1, 1.0, %v2850_v25  ;;  %v434_v37 = vrot.slane %v3071_v18, 1  ;;  %v2477_v4 = vld [vmem:[#allocation7 + $0x244] ss:$8 sps:$4 sm:$0xff]   ;;  %s3167_s1 = scalar_lea.hbm %s3218_s7, %s2285_s14  ;;  %s1950_s28 = scalar_lea.sflag [#allocation4], %s3029_s16 }
  0x82   : > { %892 = vmatpush1.bf16.msra.mxu1 %v2411_v27  ;;  %690 = vmatprep.subr.bf16.mxu0 %v2412_v28  ;;  %v422_v27 = vrot.slane %v418_v16, 7  ;;  %v437_v28 = vrot.slane %v420_v17, 1  ;;  %v481_v60 = vpack.c.bf16 %v419_v21, %v3071_v18  ;;  %v2475_v5 = vld [vmem:[#allocation7 + $0x240] ss:$8 sps:$4 sm:$0xff]   ;;  %v2483_v8 = vld [vmem:[#allocation7 + $0x224] ss:$8 sps:$4 sm:$0xff]  }
  0x83   : > { %893 = vmatprep.subr.bf16.mxu1 %v2414_v29  ;;  %v424_v29 = vrot.slane %v420_v17, 7  ;;  %708 = vmatprep.mubr.bf16.mxu0 %v482_v24  ;;  %v2481_v9 = vld [vmem:[#allocation7 + $0x220] ss:$8 sps:$4 sm:$0xff]   ;;  %v2486_v10 = vld [vmem:[#allocation7 + $0x214] ss:$8 sps:$4 sm:$0xff]   ;;  %s2768_s21 = scalar_lea.vmem %s3161_s29, 512 }
  0x84   : > { %v440_v58 = vsel %vm438_vm3, %v435_v23, %v437_v28  ;;  %v2484_v11 = vld [vmem:[#allocation7 + $0x210] ss:$8 sps:$4 sm:$0xff]   ;;  %v2492_v14 = vld [vmem:[#allocation7 + $0x2f4] ss:$8 sps:$4 sm:$0xff]   ;;  %v2495_v16 = vld [vmem:[#allocation7 + $0x2e4] ss:$8 sps:$4 sm:$0xff]   ;;  %p2769_p8 = scmp.ne.s32.totalorder %s3161_s29, %s2768_s21 }
  0x85   : > { %691 = vmatpush1.bf16.msra.mxu0 %v2416_v30  ;;  %v421_v30 = vrot.slane %v3071_v18, 7  ;;  %v2493_v17 = vld [vmem:[#allocation7 + $0x2e0] ss:$8 sps:$4 sm:$0xff]   ;;  %v2498_v18 = vld [vmem:[#allocation7 + $0x2d4] ss:$8 sps:$4 sm:$0xff]   ;;  %p3240_p12 = scmp.ne.s32.totalorder %s3230_s18, 0 }
  0x86   : > { %894 = vmatpush1.bf16.msra.mxu1 %v2417_v31  ;;  %692 = vmatprep.subr.bf16.mxu0 %v2418_v32  ;;  %v423_v31 = vrot.slane %v419_v21, 7  ;;  %v2507_v24 = vld [vmem:[#allocation7 + $0x2a4] ss:$8 sps:$4 sm:$0xff]   ;;  %v2516_v32 = vld [vmem:[#allocation8 + $0x174] ss:$8 sps:$4 sm:$0xff]   ;;  %s2851_s30 = smov [#allocation10]  }
  0x87   : > { %895 = vmatprep.subr.bf16.mxu1 %v2420_v33  ;;  %v2458_v33 = vld [vmem:[#allocation7 + $0x190] ss:$8 sps:$4 sm:$0xff]   ;;  %p2770_p7 = pnand %p2769_p8, %p3240_p12  ;;  %s2772_s9 = sshll.u32 %s2851_s30, 4  ;;  %s2773_s9 = int_to_ptr.vmem [resolvable:$false] %s2772_s9 }
  0x88   : > { %v426_v54 = vsel %vm425_vm0, %v421_v30, %v423_v31  ;;  %s2774_s23 = scalar_lea.vmem %s2773_s9, 1024  ;;  %p2775_p13 = scmp.lt.s32.totalorder %s3161_s29, %s2773_s9 }
  0x89   : > { %693 = vmatpush2.bf16.msra.mxu0 %v2422_v34  ;;  %v2459_v34 = vld [vmem:[#allocation7 + $0x90] ss:$8 sps:$4 sm:$0xff]   ;;  %p2771_p10 = pneg %p2770_p7  ;;  %p2776_p0 = scmp.lt.s32.totalorder %s2774_s23, %s2768_s21 }
  0x8a   : > { %896 = vmatpush2.bf16.msra.mxu1 %v2423_v35  ;;  %694 = vmatprep.subr.bf16.mxu0 %v2424_v36  ;;  %v427_v35 = vsel %vm425_vm0, %v422_v27, %v424_v29  ;;  %v429_v36 = vsel %vm425_vm0, %v424_v29, %v422_v27  ;;  %v2510_v27 = vld [vmem:[#allocation7 + $0x294] ss:$8 sps:$4 sm:$0xff]   ;;  %v2513_v29 = vld [vmem:[#allocation7 + $0x284] ss:$8 sps:$4 sm:$0xff]  }
  0x8b   : > { %897 = vmatprep.subr.bf16.mxu1 %v2426_v38  ;;  %v2460_v38 = vld [vmem:[#allocation7 + $0x184] ss:$8 sps:$4 sm:$0xff]   ;;  %p2777_p1 = por %p2776_p0, %p2775_p13 }
  0x8d   : > { %695 = vmatpush2.bf16.msra.mxu0 %v2428_v39  ;;  %v431_v39 = vmul.f32 %v3073_v26, %v429_v36  ;;  %v2517_v36 = vld [vmem:[#allocation8 + $0x160] ss:$8 sps:$4 sm:$0xff]   ;;  %p2778_p3 = pnand %p2777_p1, %p2771_p10 }
  0x8e   : > { %898 = vmatpush2.bf16.msra.mxu1 %v2429_v40  ;;  %696 = vmatprep.subr.bf16.mxu0 %v2430_v41  ;;  %v428_v40 = vsel %vm425_vm0, %v423_v31, %v421_v30  ;;  %v436_v41 = vrot.slane %v419_v21, 1  ;;  %v2499_v21 = vld [vmem:[#allocation7 + $0x2c0] ss:$8 sps:$4 sm:$0xff]   ;;  %v2514_v31 = vld [vmem:[#allocation8 + $0x170] ss:$8 sps:$4 sm:$0xff]  }
  0x8f   : > { %899 = vmatprep.subr.bf16.mxu1 %v2432_v43  ;;  %v2462_v43 = vld [vmem:[#allocation7 + $0x84] ss:$8 sps:$4 sm:$0xff]   ;;  %v2511_v30 = vld [vmem:[#allocation7 + $0x280] ss:$8 sps:$4 sm:$0xff]  }
  0x90   : > { %v441_v52 = vsel %vm438_vm3, %v436_v41, %v434_v37 }
  0x91   : > { %697 = vmatpush2.bf16.msra.mxu0 %v2434_v44  ;;  %v3091_v44 = vsel %vm3076_vm2, 1.0, %v2850_v25  ;;  %v2505_v25 = vld [vmem:[#allocation7 + $0x2a0] ss:$8 sps:$4 sm:$0xff]  }
  0x92   : > { %900 = vmatpush2.bf16.msra.mxu1 %v2435_v45  ;;  %698 = vmatprep.subr.bf16.mxu0 %v2436_v46  ;;  %v442_v45 = vsel %vm438_vm3, %v437_v28, %v435_v23  ;;  %v448_v46 = vpack.c.bf16 %v427_v35, %v431_v39  ;;  %v3106_v56 = vmul.f32 %v3091_v44, %v441_v52  ;;  %v2502_v23 = vld [vmem:[#allocation7 + $0x2b0] ss:$8 sps:$4 sm:$0xff]   ;;  %v2522_v35 = vld [vmem:[#allocation8 + $0x74] ss:$8 sps:$4 sm:$0xff]   ;;  %v2526_v39 = vld [vmem:[#allocation8 + $0x60] ss:$8 sps:$4 sm:$0xff]  }
  0x93   : > { %901 = vmatprep.subr.bf16.mxu1 %v2438_v49  ;;  %v3097_v49 = vsel %vm438_vm3, %v434_v37, %v436_v41  ;;  %v446_v55 = vmul.f32 %v3091_v44, %v442_v45  ;;  %v2508_v28 = vld [vmem:[#allocation7 + $0x290] ss:$8 sps:$4 sm:$0xff]   ;;  %v2528_v37 = vld [vmem:[#allocation8 + $0x64] ss:$8 sps:$4 sm:$0xff]   ;;  %v2546_v52 = vld [vmem:[#allocation8 + $0x34] ss:$8 sps:$4 sm:$0xff]  }
  0x94   : > { %911 = vmatprep.mubr.bf16.mxu1 %v448_v46  ;;  %v922_v59 = vpack.c.bf16 %v3106_v56, %v3097_v49  ;;  %v2523_v41 = vld [vmem:[#allocation8 + $0x150] ss:$8 sps:$4 sm:$0xff]   ;;  %v2540_v46 = vld [vmem:[#allocation8 + $0x44] ss:$8 sps:$4 sm:$0xff]   ;;  %v2529_v49 = vld [vmem:[#allocation8 + $0x140] ss:$8 sps:$4 sm:$0xff]  }
  0x95   : > { %699 = vmatpush2.bf16.msra.mxu0 %v2440_v50  ;;  %v2464_v50 = vld [vmem:[#allocation7 + $0x180] ss:$8 sps:$4 sm:$0xff]   ;;  %v2532_v45 = vld [vmem:[#allocation8 + $0x50] ss:$8 sps:$4 sm:$0xff]   ;;  %v2552_v56 = vld [vmem:[#allocation8 + $0x24] ss:$8 sps:$4 sm:$0xff]  }
  0x96   : > { %902 = vmatpush2.bf16.msra.mxu1 %v2441_v51  ;;  %700 = vmatprep.subr.bf16.mxu0 %v2442_v62  ;;  %v430_v51 = vmul.f32 %v3073_v26, %v428_v40  ;;  %v2466_v62 = vld [vmem:[#allocation7 + $0x270] ss:$8 sps:$4 sm:$0xff]   ;;  %v2534_v40 = vld [vmem:[#allocation8 + $0x54] ss:$8 sps:$4 sm:$0xff]  }
  0x97   : > { %903 = vmatprep.subr.bf16.mxu1 %v2444_v63  ;;  %v923_v63 = vpack.c.bf16 %v446_v55, %v440_v58  ;;  %v2544_v55 = vld [vmem:[#allocation8 + $0x30] ss:$8 sps:$4 sm:$0xff]   ;;  %v2549_v58 = vld [vmem:[#allocation8 + $0x114] ss:$8 sps:$4 sm:$0xff]  }
  0x98   : > { %v447_v61 = vpack.c.bf16 %v426_v54, %v430_v51  ;;  %v2538_v51 = vld [vmem:[#allocation8 + $0x40] ss:$8 sps:$4 sm:$0xff]   ;;  %v2543_v54 = vld [vmem:[#allocation8 + $0x124] ss:$8 sps:$4 sm:$0xff]  }
  0x99   : > { %701 = vmatpush2.bf16.msra.mxu0 %v2446_v6  ;;  %v2480_v6 = vld [vmem:[#allocation7 + $0x234] ss:$8 sps:$4 sm:$0xff]  }
  0x9a   : > { %904 = vmatpush2.bf16.msra.mxu1 %v2447_v7  ;;  %702 = vmatprep.subr.bf16.mxu0 %v2448_v12  ;;  %v2478_v7 = vld [vmem:[#allocation7 + $0x230] ss:$8 sps:$4 sm:$0xff]   ;;  %v2489_v12 = vld [vmem:[#allocation7 + $0x204] ss:$8 sps:$4 sm:$0xff]  }
  0x9b   : > { %905 = vmatprep.subr.bf16.mxu1 %v2450_v13  ;;  %v2487_v13 = vld [vmem:[#allocation7 + $0x200] ss:$8 sps:$4 sm:$0xff]  }
  0x9d   : > { %703 = vmatpush2.bf16.msra.mxu0 %v2452_v15  ;;  %v2490_v15 = vld [vmem:[#allocation7 + $0x2f0] ss:$8 sps:$4 sm:$0xff]  }
  0x9e   : > { %906 = vmatpush2.bf16.msra.mxu1 %v2453_v19  ;;  %704 = vmatprep.subr.bf16.mxu0 %v2454_v20  ;;  %v2496_v19 = vld [vmem:[#allocation7 + $0x2d0] ss:$8 sps:$4 sm:$0xff]   ;;  %v2501_v20 = vld [vmem:[#allocation7 + $0x2c4] ss:$8 sps:$4 sm:$0xff]  }
  0x9f   : > { %907 = vmatprep.subr.bf16.mxu1 %v2456_v22  ;;  %v2504_v22 = vld [vmem:[#allocation7 + $0x2b4] ss:$8 sps:$4 sm:$0xff]  }
  0xa1   : > { %705 = vmatpush2.bf16.msra.mxu0 %v2458_v33  ;;  %v2519_v33 = vld [vmem:[#allocation8 + $0x164] ss:$8 sps:$4 sm:$0xff]  }
  0xa2   : > { %908 = vmatpush2.bf16.msra.mxu1 %v2459_v34  ;;  %706 = vmatprep.subr.bf16.mxu0 %v2460_v38  ;;  %v2520_v34 = vld [vmem:[#allocation8 + $0x70] ss:$8 sps:$4 sm:$0xff]   ;;  %v2525_v38 = vld [vmem:[#allocation8 + $0x154] ss:$8 sps:$4 sm:$0xff]  }
  0xa3   : > { %909 = vmatprep.subr.bf16.mxu1 %v2462_v43  ;;  %v2531_v43 = vld [vmem:[#allocation8 + $0x144] ss:$8 sps:$4 sm:$0xff]  }
  0xa5   : > { %707 = vmatpush2.bf16.msra.mxu0 %v2464_v50  ;;  %v2537_v50 = vld [vmem:[#allocation8 + $0x134] ss:$8 sps:$4 sm:$0xff]  }
  0xa6   : > { %910 = vmatpush2.bf16.msra.mxu1 %v2465_v53  ;;  %1117 = vmatprep.subr.bf16.mxu0 %v2468_v57  ;;  %v2535_v53 = vld [vmem:[#allocation8 + $0x130] ss:$8 sps:$4 sm:$0xff]   ;;  %v2541_v57 = vld [vmem:[#allocation8 + $0x120] ss:$8 sps:$4 sm:$0xff]  }
  0xa7   : > { %1453 = vmatprep.subr.bf16.mxu1 %v2516_v32  ;;  %v2604_v32 = vld [vmem:[#allocation8 + $0x90] ss:$8 sps:$4 sm:$0xff]  }
  0xa8   : > { %709 = vmatmul.mubr.bf16.vlgmr.msra.gmra.mxu0 %v481_v60  ;;  %v2558_v60 = vld [vmem:[#allocation8 + $0x14] ss:$8 sps:$4 sm:$0xff]  }
  0xa9   : > { %912 = vmatmul.mubr.bf16.vlgmr.msra.gmra.mxu1 %v447_v61  ;;  %1118 = vmatpush1.bf16.msra.mxu0 %v2466_v62  ;;  %v2547_v61 = vld [vmem:[#allocation8 + $0x110] ss:$8 sps:$4 sm:$0xff]   ;;  %v2555_v62 = vld [vmem:[#allocation8 + $0x104] ss:$8 sps:$4 sm:$0xff]  }
  0xaa   : > { %1149 = vmatprep.mubr.bf16.mxu0 %v923_v63  ;;  %1119 = vmatprep.subr.bf16.mxu0 %v2471_v0  ;;  %v2556_v63 = vld [vmem:[#allocation8 + $0x10] ss:$8 sps:$4 sm:$0xff]   ;;  %v2564_v0 = vld [vmem:[#allocation8 + $0x4] ss:$8 sps:$4 sm:$0xff]  }
  0xab   : > { %1454 = vmatpush1.bf16.msra.mxu1 %v2514_v31  ;;  %v2601_v31 = vld [vmem:[#allocation8 + $0x180] ss:$8 sps:$4 sm:$0xff]  }
  0xac   : > { %1455 = vmatprep.subr.bf16.mxu1 %v2519_v33  ;;  %v2606_v33 = vld [vmem:[#allocation8 + $0x94] ss:$8 sps:$4 sm:$0xff]  }
  0xad   : > { %1120 = vmatpush1.bf16.msra.mxu0 %v2469_v1  ;;  %v2553_v1 = vld [vmem:[#allocation8 + $0x100] ss:$8 sps:$4 sm:$0xff]  }
  0xae   : > { %1121 = vmatprep.subr.bf16.mxu0 %v2474_v2  ;;  %v2561_v2 = vld [vmem:[#allocation8 + $0x1f4] ss:$8 sps:$4 sm:$0xff]  }
  0xaf   : > { %1456 = vmatpush1.bf16.msra.mxu1 %v2517_v36  ;;  %v2610_v36 = vld [vmem:[#allocation8 + $0x80] ss:$8 sps:$4 sm:$0xff]  }
  0xb0   : > { %1457 = vmatprep.subr.bf16.mxu1 %v2525_v38 }
  0xb1   : > { %1122 = vmatpush1.bf16.msra.mxu0 %v2472_v3  ;;  %v2562_v3 = vld [vmem:[#allocation8] ss:$8 sps:$4 sm:$0xff]  }
  0xb2   : > { %1123 = vmatprep.subr.bf16.mxu0 %v2477_v4  ;;  %v2570_v4 = vld [vmem:[#allocation8 + $0xf4] ss:$8 sps:$4 sm:$0xff]  }
  0xb3   : > { %1458 = vmatpush1.bf16.msra.mxu1 %v2523_v41 }
  0xb4   : > { %1459 = vmatprep.subr.bf16.mxu1 %v2531_v43  ;;  %v1164_v43 = vld [vmem:[%s3215_s4] sm:$0x3] }
  0xb5   : > { %1124 = vmatpush1.bf16.msra.mxu0 %v2475_v5  ;;  %v2559_v5 = vld [vmem:[#allocation8 + $0x1f0] ss:$8 sps:$4 sm:$0xff]  }
  0xb6   : > { %1125 = vmatprep.subr.bf16.mxu0 %v2480_v6  ;;  %v2567_v6 = vld [vmem:[#allocation8 + $0x1e4] ss:$8 sps:$4 sm:$0xff]  }
  0xb7   : > { %1460 = vmatpush1.bf16.msra.mxu1 %v2529_v49  ;;  %v1180_v49 = vld [vmem:[%s3216_s5] sm:$0x3] }
  0xb8   : > { %1461 = vmatprep.subr.bf16.mxu1 %v2537_v50 }
  0xb9   : > { %1126 = vmatpush1.bf16.msra.mxu0 %v2478_v7  ;;  %v2568_v7 = vld [vmem:[#allocation8 + $0xf0] ss:$8 sps:$4 sm:$0xff]  }
  0xba   : > { %1127 = vmatprep.subr.bf16.mxu0 %v2483_v8  ;;  %v2576_v8 = vld [vmem:[#allocation8 + $0xe4] ss:$8 sps:$4 sm:$0xff]  }
  0xbb   : > { %1462 = vmatpush1.bf16.msra.mxu1 %v2535_v53 }
  0xbc   : > { %1463 = vmatprep.subr.bf16.mxu1 %v2543_v54 }
  0xbd   : > { %1128 = vmatpush1.bf16.msra.mxu0 %v2481_v9  ;;  %v2565_v9 = vld [vmem:[#allocation8 + $0x1e0] ss:$8 sps:$4 sm:$0xff]  }
  0xbe   : > { %1129 = vmatprep.subr.bf16.mxu0 %v2486_v10  ;;  %v2573_v10 = vld [vmem:[#allocation8 + $0x1d4] ss:$8 sps:$4 sm:$0xff]  }
  0xbf   : > { %1464 = vmatpush1.bf16.msra.mxu1 %v2541_v57 }
  0xc0   : > { %1465 = vmatprep.subr.bf16.mxu1 %v2549_v58 }
  0xc1   : > { %1130 = vmatpush1.bf16.msra.mxu0 %v2484_v11  ;;  %v2574_v11 = vld [vmem:[#allocation8 + $0xe0] ss:$8 sps:$4 sm:$0xff]  }
  0xc2   : > { %1131 = vmatprep.subr.bf16.mxu0 %v2489_v12  ;;  %v2582_v12 = vld [vmem:[#allocation8 + $0xd4] ss:$8 sps:$4 sm:$0xff]  }
  0xc3   : > { %1466 = vmatpush1.bf16.msra.mxu1 %v2547_v61 }
  0xc4   : > { %1467 = vmatprep.subr.bf16.mxu1 %v2555_v62  ;;  %v1189_v62 = vrot.slane %v1180_v49, %v3055_v48 }
  0xc5   : > { %1132 = vmatpush1.bf16.msra.mxu0 %v2487_v13  ;;  %v2571_v13 = vld [vmem:[#allocation8 + $0x1d0] ss:$8 sps:$4 sm:$0xff]  }
  0xc6   : > { %1133 = vmatprep.subr.bf16.mxu0 %v2492_v14  ;;  %v2579_v14 = vld [vmem:[#allocation8 + $0x1c4] ss:$8 sps:$4 sm:$0xff]  }
  0xc7   : > { %1468 = vmatpush1.bf16.msra.mxu1 %v2553_v1 }
  0xc8   : > { %1469 = vmatprep.subr.bf16.mxu1 %v2561_v2 }
  0xc9   : > { %1134 = vmatpush2.bf16.msra.mxu0 %v2490_v15  ;;  %v2580_v15 = vld [vmem:[#allocation8 + $0xd0] ss:$8 sps:$4 sm:$0xff]  }
  0xca   : > { %1135 = vmatprep.subr.bf16.mxu0 %v2495_v16  ;;  %v2577_v16 = vld [vmem:[#allocation8 + $0x1c0] ss:$8 sps:$4 sm:$0xff]  }
  0xcb   : > { %1470 = vmatpush2.bf16.msra.mxu1 %v2559_v5 }
  0xcc   : > { %1471 = vmatprep.subr.bf16.mxu1 %v2567_v6 }
  0xcd   : > { %1136 = vmatpush2.bf16.msra.mxu0 %v2493_v17  ;;  %v2585_v17 = vld [vmem:[#allocation8 + $0x1b4] ss:$8 sps:$4 sm:$0xff]  }
  0xce   : > { %1137 = vmatprep.subr.bf16.mxu0 %v2498_v18  ;;  %v2583_v18 = vld [vmem:[#allocation8 + $0x1b0] ss:$8 sps:$4 sm:$0xff]  }
  0xcf   : > { %1472 = vmatpush2.bf16.msra.mxu1 %v2565_v9 }
  0xd0   : > { %1473 = vmatprep.subr.bf16.mxu1 %v2573_v10 }
  0xd1   : > { %1138 = vmatpush2.bf16.msra.mxu0 %v2496_v19  ;;  %v2588_v19 = vld [vmem:[#allocation8 + $0xc4] ss:$8 sps:$4 sm:$0xff]  }
  0xd2   : > { %1139 = vmatprep.subr.bf16.mxu0 %v2501_v20  ;;  %v2586_v20 = vld [vmem:[#allocation8 + $0xc0] ss:$8 sps:$4 sm:$0xff]  }
  0xd3   : > { %1474 = vmatpush2.bf16.msra.mxu1 %v2571_v13 }
  0xd4   : > { %1475 = vmatprep.subr.bf16.mxu1 %v2579_v14 }
  0xd5   : > { %1140 = vmatpush2.bf16.msra.mxu0 %v2499_v21  ;;  %v2591_v21 = vld [vmem:[#allocation8 + $0x1a4] ss:$8 sps:$4 sm:$0xff]  }
  0xd6   : > { %1141 = vmatprep.subr.bf16.mxu0 %v2504_v22  ;;  %v2589_v22 = vld [vmem:[#allocation8 + $0x1a0] ss:$8 sps:$4 sm:$0xff]  }
  0xd7   : > { %1476 = vmatpush2.bf16.msra.mxu1 %v2577_v16 }
  0xd8   : > { %1477 = vmatprep.subr.bf16.mxu1 %v2585_v17 }
  0xd9   : > { %1142 = vmatpush2.bf16.msra.mxu0 %v2502_v23  ;;  %v2594_v23 = vld [vmem:[#allocation8 + $0xb4] ss:$8 sps:$4 sm:$0xff]  }
  0xda   : > { %1143 = vmatprep.subr.bf16.mxu0 %v2507_v24  ;;  %v2592_v24 = vld [vmem:[#allocation8 + $0xb0] ss:$8 sps:$4 sm:$0xff]  }
  0xdb   : > { %1478 = vmatpush2.bf16.msra.mxu1 %v2583_v18  ;;  %v2607_v18 = vld [vmem:[#allocation8 + $0x270] ss:$8 sps:$4 sm:$0xff]  }
  0xdc   : > { %1479 = vmatprep.subr.bf16.mxu1 %v2591_v21 }
  0xdd   : > { %1144 = vmatpush2.bf16.msra.mxu0 %v2505_v25  ;;  %v2597_v25 = vld [vmem:[#allocation8 + $0x194] ss:$8 sps:$4 sm:$0xff]  }
  0xde   : > { %1145 = vmatprep.subr.bf16.mxu0 %v2510_v27  ;;  %v2595_v27 = vld [vmem:[#allocation8 + $0x190] ss:$8 sps:$4 sm:$0xff]  }
  0xdf   : > { %1480 = vmatpush2.bf16.msra.mxu1 %v2589_v22 }
  0xe0   : > { %1481 = vmatprep.subr.bf16.mxu1 %v2597_v25 }
  0xe1   : > { %1146 = vmatpush2.bf16.msra.mxu0 %v2508_v28  ;;  %v2600_v28 = vld [vmem:[#allocation8 + $0xa4] ss:$8 sps:$4 sm:$0xff]  }
  0xe2   : > { %1147 = vmatprep.subr.bf16.mxu0 %v2513_v29  ;;  %v2598_v29 = vld [vmem:[#allocation8 + $0xa0] ss:$8 sps:$4 sm:$0xff]  }
  0xe3   : > { %1482 = vmatpush2.bf16.msra.mxu1 %v2595_v27 }
  0xe5   : > { %1148 = vmatpush2.bf16.msra.mxu0 %v2511_v30  ;;  %v2603_v30 = vld [vmem:[#allocation8 + $0x184] ss:$8 sps:$4 sm:$0xff]  }
  0xe6   : > { %1656 = vmatprep.subr.bf16.mxu0 %v2522_v35  ;;  %1483 = vmatprep.subr.bf16.mxu1 %v2603_v30  ;;  %v2612_v35 = vld [vmem:[#allocation8 + $0x84] ss:$8 sps:$4 sm:$0xff]   ;;  %v2613_v30 = vld [vmem:[#allocation8 + $0x260] ss:$8 sps:$4 sm:$0xff]  }
  0xe7   : > { %1484 = vmatpush2.bf16.msra.mxu1 %v2601_v31 }
  0xe8   : > { %1150 = vmatmul.mubr.bf16.vlgmr.msra.gmra.mxu0 %v922_v59  ;;  %v2550_v59 = vld [vmem:[#allocation8 + $0x20] ss:$8 sps:$4 sm:$0xff]  }
  0xe9   : > { %1657 = vmatpush1.bf16.msra.mxu0 %v2520_v34  ;;  %v2609_v34 = vld [vmem:[#allocation8 + $0x274] ss:$8 sps:$4 sm:$0xff]  }
  0xea   : > { %1658 = vmatprep.subr.bf16.mxu0 %v2528_v37  ;;  %1894 = vmatprep.subr.bf16.mxu1 %v2609_v34 }
  0xed   : > { %1659 = vmatpush1.bf16.msra.mxu0 %v2526_v39 }
  0xee   : > { %1660 = vmatprep.subr.bf16.mxu0 %v2534_v40 }
  0xf1   : > { %1661 = vmatpush1.bf16.msra.mxu0 %v2532_v45 }
  0xf2   : > { %1662 = vmatprep.subr.bf16.mxu0 %v2540_v46 }
  0xf5   : > { %1663 = vmatpush1.bf16.msra.mxu0 %v2538_v51  ;;  %v1169_v51 = vrot.slane %v1164_v43, %v3052_v47 }
  0xf6   : > { %1664 = vmatprep.subr.bf16.mxu0 %v2546_v52 }
  0xf9   : > { %1665 = vmatpush1.bf16.msra.mxu0 %v2544_v55  ;;  %v1185_v55 = vrot.slane %v1180_v49, %v3052_v47  ;;  %v2628_v49 = vld [vmem:[#allocation8 + $0x210] ss:$8 sps:$4 sm:$0xff]  }
  0xfa   : > { %1666 = vmatprep.subr.bf16.mxu0 %v2552_v56  ;;  %v1173_v56 = vrot.slane %v1164_v43, %v3055_v48  ;;  %v2627_v43 = vld [vmem:[#allocation8 + $0x224] ss:$8 sps:$4 sm:$0xff]  }
  0xfd   : > { %1667 = vmatpush1.bf16.msra.mxu0 %v2550_v59 }
  0xfe   : > { %1668 = vmatprep.subr.bf16.mxu0 %v2558_v60 }
 0x101   : > { %1669 = vmatpush1.bf16.msra.mxu0 %v2556_v63 }
 0x102   : > { %1670 = vmatprep.subr.bf16.mxu0 %v2564_v0 }
 0x105   : > { %1671 = vmatpush1.bf16.msra.mxu0 %v2562_v3 }
 0x106   : > { %1672 = vmatprep.subr.bf16.mxu0 %v2570_v4 }
 0x109   : > { %1673 = vmatpush2.bf16.msra.mxu0 %v2568_v7 }
 0x10a   : > { %1674 = vmatprep.subr.bf16.mxu0 %v2576_v8 }
 0x10d   : > { %1675 = vmatpush2.bf16.msra.mxu0 %v2574_v11 }
 0x10e   : > { %1676 = vmatprep.subr.bf16.mxu0 %v2582_v12 }
 0x111   : > { %1677 = vmatpush2.bf16.msra.mxu0 %v2580_v15 }
 0x112   : > { %1678 = vmatprep.subr.bf16.mxu0 %v2588_v19 }
 0x115   : > { %1679 = vmatpush2.bf16.msra.mxu0 %v2586_v20 }
 0x116   : > { %1680 = vmatprep.subr.bf16.mxu0 %v2594_v23  ;;  %v2615_v23 = vld [vmem:[#allocation8 + $0x264] ss:$8 sps:$4 sm:$0xff]  }
 0x119   : > { %1681 = vmatpush2.bf16.msra.mxu0 %v2592_v24 }
 0x11a   : > { %1682 = vmatprep.subr.bf16.mxu0 %v2600_v28 }
 0x11d   : > { %1683 = vmatpush2.bf16.msra.mxu0 %v2598_v29 }
 0x11e   : > { %1684 = vmatprep.subr.bf16.mxu0 %v2606_v33 }
 0x121   : > { %1685 = vmatpush2.bf16.msra.mxu0 %v2604_v32 }
 0x122   : > { %1686 = vmatprep.subr.bf16.mxu0 %v2612_v35 }
 0x125   : > { %1687 = vmatpush2.bf16.msra.mxu0 %v2610_v36  ;;  %v2618_v36 = vld [vmem:[#allocation8 + $0x254] ss:$8 sps:$4 sm:$0xff]  }
 0x168   : > { %v710_v37 = vpop.f32.mrf.mxu0 }
 0x169   : > { %v913_v38 = vpop.f32.mrf.mxu1 }
 0x16a   : > { %v712_v39 = vpop.f32.mrf.mxu0  ;;  %v914_v50 = vadd.f32 %v913_v38, %v710_v37  ;;  %v2621_v38 = vld [vmem:[#allocation8 + $0x244] ss:$8 sps:$4 sm:$0xff]  }
 0x16b   : > { %v915_v40 = vpop.f32.mrf.mxu1 }
 0x16c   : > { %v714_v41 = vpop.f32.mrf.mxu0  ;;  %v916_v53 = vadd.f32 %v915_v40, %v712_v39  ;;  %v2619_v39 = vld [vmem:[#allocation8 + $0x240] ss:$8 sps:$4 sm:$0xff]   ;;  %v2624_v40 = vld [vmem:[#allocation8 + $0x234] ss:$8 sps:$4 sm:$0xff]  }
 0x16d   : > { %v917_v45 = vpop.f32.mrf.mxu1 }
 0x16e   : > { %v716_v46 = vpop.f32.mrf.mxu0  ;;  %v918_v59 = vadd.f32 %v917_v45, %v714_v41  ;;  %v2622_v41 = vld [vmem:[#allocation8 + $0x230] ss:$8 sps:$4 sm:$0xff]   ;;  %v2625_v45 = vld [vmem:[#allocation8 + $0x220] ss:$8 sps:$4 sm:$0xff]  }
 0x16f   : > { %v919_v57 = vpop.f32.mrf.mxu1 }
 0x170   : > { %v920_v0 = vadd.f32 %v919_v57, %v716_v46  ;;  %v2630_v46 = vld [vmem:[#allocation8 + $0x214] ss:$8 sps:$4 sm:$0xff]   ;;  %v2640_v57 = vld [vmem:[#allocation8 + $0x2d0] ss:$8 sps:$4 sm:$0xff]  }
 0x1a8   : > { %v1151_v52 = vpop.f32.mrf.mxu0 }
 0x1a9   : > { %v1160_v54 = vadd.f32 %v1151_v52, %v914_v50  ;;  %v2633_v50 = vld [vmem:[#allocation8 + $0x204] ss:$8 sps:$4 sm:$0xff]   ;;  %v2636_v52 = vld [vmem:[#allocation8 + $0x2f4] ss:$8 sps:$4 sm:$0xff]  }
 0x1aa   : > { %v1153_v58 = vpop.f32.mrf.mxu0 }
 0x1ab   : > { %v1176_v60 = vmul.f32 %v1169_v51, %v1160_v54  ;;  %v1161_v61 = vadd.f32 %v1153_v58, %v916_v53  ;;  %v2634_v53 = vld [vmem:[#allocation8 + $0x2f0] ss:$8 sps:$4 sm:$0xff]   ;;  %v2639_v54 = vld [vmem:[#allocation8 + $0x2e4] ss:$8 sps:$4 sm:$0xff]  }
 0x1ac   : > { %v1155_v63 = vpop.f32.mrf.mxu0  ;;  %v2645_v58 = vld [vmem:[#allocation8 + $0x2c4] ss:$8 sps:$4 sm:$0xff]  }
 0x1ad   : > { %v1192_v1 = vadd.f32 %v1185_v55, %v1176_v60  ;;  %v1177_v2 = vmul.f32 %v1173_v56, %v1161_v61  ;;  %v1162_v3 = vadd.f32 %v1155_v63, %v918_v59  ;;  %v2643_v59 = vld [vmem:[#allocation8 + $0x2c0] ss:$8 sps:$4 sm:$0xff]   ;;  %v2648_v60 = vld [vmem:[#allocation8 + $0x2b4] ss:$8 sps:$4 sm:$0xff]   ;;  %v2646_v61 = vld [vmem:[#allocation8 + $0x2b0] ss:$8 sps:$4 sm:$0xff]  }
 0x1ae   : > { %v1157_v4 = vpop.f32.mrf.mxu0  ;;  %v2649_v63 = vld [vmem:[#allocation8 + $0x2a0] ss:$8 sps:$4 sm:$0xff]  }
 0x1af   : > { %v1193_v5 = vadd.f32 %v1189_v62, %v1177_v2  ;;  %v1178_v6 = vmul.f32 %v1169_v51, %v1162_v3  ;;  %v1163_v7 = vadd.f32 %v1157_v4, %v920_v0  ;;  %v3126_v8 = vmax.f32 %v1192_v1, 0.0  ;;  %v2631_v51 = vld [vmem:[#allocation8 + $0x200] ss:$8 sps:$4 sm:$0xff]   ;;  %v2654_v0 = vld [vmem:[#allocation8 + $0x294] ss:$8 sps:$4 sm:$0xff]  }
 0x1b0   : > { %v2652_v3 = vld [vmem:[#allocation8 + $0x290] ss:$8 sps:$4 sm:$0xff]   ;;  %v2657_v4 = vld [vmem:[#allocation8 + $0x284] ss:$8 sps:$4 sm:$0xff]  }
 0x1b1   : > { %v1194_v47 = vadd.f32 %v1185_v55, %v1178_v6  ;;  %v1179_v9 = vmul.f32 %v1173_v56, %v1163_v7  ;;  %v1197_v10 = vmax.f32 %v1193_v5, 0.0  ;;  %v1200_v13 = vrot.slane %v3126_v8, 7  ;;  %v2637_v55 = vld [vmem:[#allocation8 + $0x2e0] ss:$8 sps:$4 sm:$0xff]   ;;  %v2642_v56 = vld [vmem:[#allocation8 + $0x2d4] ss:$8 sps:$4 sm:$0xff]  }
 0x1b2   : > { %v1212_v2 = vrot.slane %v3126_v8, 1  ;;  %v2655_v6 = vld [vmem:[#allocation8 + $0x280] ss:$8 sps:$4 sm:$0xff]  }
 0x1b3   : > { %v3128_v11 = vmax.f32 %v1194_v47, 0.0  ;;  %v1195_v12 = vadd.f32 %v1189_v62, %v1179_v9  ;;  %v1201_v15 = vrot.slane %v1197_v10, 7  ;;  %v1213_v20 = vrot.slane %v1197_v10, 1  ;;  %v2651_v62 = vld [vmem:[#allocation8 + $0x2a4] ss:$8 sps:$4 sm:$0xff]  }
 0x1b5   : > { %v1202_v48 = vrot.slane %v3128_v11, 7  ;;  %v1199_v14 = vmax.f32 %v1195_v12, 0.0  ;;  %v1258_v22 = vpack.c.bf16 %v3128_v11, %v3126_v8  ;;  %v1214_v1 = vrot.slane %v3128_v11, 1 }
 0x1b7   : > { %v1206_v16 = vsel %vm425_vm0, %v1202_v48, %v1200_v13  ;;  %v1259_v17 = vpack.c.bf16 %v1199_v14, %v1197_v10  ;;  %v1203_v19 = vrot.slane %v1199_v14, 7  ;;  %v1215_v21 = vrot.slane %v1199_v14, 1 }
 0x1b8   : > { %v1208_v27 = vmul.f32 %v3073_v26, %v1206_v16  ;;  %v1204_v35 = vsel %vm425_vm0, %v1200_v13, %v1202_v48  ;;  %v1218_v5 = vsel %vm438_vm3, %v1214_v1, %v1212_v2  ;;  %v1216_v47 = vsel %vm438_vm3, %v1212_v2, %v1214_v1 }
 0x1b9   : > { %1485 = vmatprep.mubr.bf16.mxu1 %v1259_v17  ;;  %v1207_v24 = vsel %vm425_vm0, %v1203_v19, %v1201_v15  ;;  %v1219_v25 = vsel %vm438_vm3, %v1215_v21, %v1213_v20  ;;  %v1205_v31 = vsel %vm425_vm0, %v1201_v15, %v1203_v19  ;;  %v1217_v32 = vsel %vm438_vm3, %v1213_v20, %v1215_v21  ;;  %v2658_v20 = vld [vmem:[%s3035_s22] sm:$0xff] }
 0x1ba   : > { %1486 = vmatmul.mubr.bf16.vlgmr.msra.gmra.mxu1 %v1258_v22  ;;  %v1209_v28 = vmul.f32 %v3073_v26, %v1207_v24  ;;  %v1223_v29 = vmul.f32 %v3091_v44, %v1219_v25  ;;  %v1224_v37 = vpack.c.bf16 %v1204_v35, %v1208_v27  ;;  %v2616_v26 = vld [vmem:[#allocation8 + $0x250] ss:$8 sps:$4 sm:$0xff]   ;;  %v1222_v7 = vmul.f32 %v3091_v44, %v1218_v5  ;;  %v2659_v25 = vld [vmem:[%s3035_s22 + $0x8] sm:$0xff] }
 0x1bb   : > { %1895 = vmatpush1.bf16.msra.mxu1 %v2607_v18 }
 0x1bc   : > { %1896 = vmatprep.subr.bf16.mxu1 %v2615_v23  ;;  %v1225_v33 = vpack.c.bf16 %v1205_v31, %v1209_v28  ;;  %v1700_v34 = vpack.c.bf16 %v1223_v29, %v1217_v32  ;;  %v1699_v9 = vpack.c.bf16 %v1222_v7, %v1216_v47 }
 0x1be   : > { %1688 = vmatprep.mubr.bf16.mxu0 %v1225_v33  ;;  %1926 = vmatprep.mubr.bf16.mxu1 %v1700_v34  ;;  %v2661_v33 = vld [vmem:[%s3035_s22 + $0x18] sm:$0xff] }
 0x1bf   : > { %1897 = vmatpush1.bf16.msra.mxu1 %v2613_v30  ;;  %1689 = vmatmul.mubr.bf16.vlgmr.msra.gmra.mxu0 %v1224_v37  ;;  %v2660_v30 = vld [vmem:[%s3035_s22 + $0x10] sm:$0xff] }
 0x1c0   : > { %1898 = vmatprep.subr.bf16.mxu1 %v2618_v36 }
 0x1c3   : > { %1899 = vmatpush1.bf16.msra.mxu1 %v2616_v26 }
 0x1c4   : > { %1900 = vmatprep.subr.bf16.mxu1 %v2621_v38 }
 0x1c7   : > { %1901 = vmatpush1.bf16.msra.mxu1 %v2619_v39 }
 0x1c8   : > { %1902 = vmatprep.subr.bf16.mxu1 %v2624_v40 }
 0x1cb   : > { %1903 = vmatpush1.bf16.msra.mxu1 %v2622_v41 }
 0x1cc   : > { %1904 = vmatprep.subr.bf16.mxu1 %v2627_v43 }
 0x1cf   : > { %1905 = vmatpush1.bf16.msra.mxu1 %v2625_v45 }
 0x1d0   : > { %1906 = vmatprep.subr.bf16.mxu1 %v2630_v46 }
 0x1d3   : > { %1907 = vmatpush1.bf16.msra.mxu1 %v2628_v49 }
 0x1d4   : > { %1908 = vmatprep.subr.bf16.mxu1 %v2633_v50 }
 0x1d7   : > { %1909 = vmatpush1.bf16.msra.mxu1 %v2631_v51 }
 0x1d8   : > { %1910 = vmatprep.subr.bf16.mxu1 %v2636_v52 }
 0x1db   : > { %1911 = vmatpush2.bf16.msra.mxu1 %v2634_v53 }
 0x1dc   : > { %1912 = vmatprep.subr.bf16.mxu1 %v2639_v54 }
 0x1df   : > { %1913 = vmatpush2.bf16.msra.mxu1 %v2637_v55 }
 0x1e0   : > { %1914 = vmatprep.subr.bf16.mxu1 %v2642_v56 }
 0x1e3   : > { %1915 = vmatpush2.bf16.msra.mxu1 %v2640_v57 }
 0x1e4   : > { %1916 = vmatprep.subr.bf16.mxu1 %v2645_v58 }
 0x1e7   : > { %1917 = vmatpush2.bf16.msra.mxu1 %v2643_v59 }
 0x1e8   : > { %1918 = vmatprep.subr.bf16.mxu1 %v2648_v60 }
 0x1eb   : > { %1919 = vmatpush2.bf16.msra.mxu1 %v2646_v61 }
 0x1ec   : > { %1920 = vmatprep.subr.bf16.mxu1 %v2651_v62 }
 0x1ef   : > { %1921 = vmatpush2.bf16.msra.mxu1 %v2649_v63 }
 0x1f0   : > { %1922 = vmatprep.subr.bf16.mxu1 %v2654_v0 }
 0x1f3   : > { %1923 = vmatpush2.bf16.msra.mxu1 %v2652_v3 }
 0x1f4   : > { %1924 = vmatprep.subr.bf16.mxu1 %v2657_v4 }
 0x1f7   : > { %1925 = vmatpush2.bf16.msra.mxu1 %v2655_v6 }
 0x1fa   : > { %1927 = vmatmul.mubr.bf16.vlgmr.msra.gmra.mxu1 %v1699_v9 }
 0x27a   : > { %v1487_v8 = vpop.f32.mrf.mxu1 }
 0x27c   : > { %v1489_v10 = vpop.f32.mrf.mxu1 }
 0x27e   : > { %v1491_v12 = vpop.f32.mrf.mxu1 }
 0x27f   : > { %v1690_v11 = vpop.f32.mrf.mxu0 }
 0x280   : > { %v1493_v48 = vpop.f32.mrf.mxu1  ;;  %v1691_v15 = vadd.f32 %v1690_v11, %v1487_v8 }
 0x281   : > { %v1692_v13 = vpop.f32.mrf.mxu0 }
 0x282   : > { %v1693_v17 = vadd.f32 %v1692_v13, %v1489_v10 }
 0x283   : > { %v1694_v14 = vpop.f32.mrf.mxu0 }
 0x284   : > { %v1695_v19 = vadd.f32 %v1694_v14, %v1491_v12 }
 0x285   : > { %v1696_v18 = vpop.f32.mrf.mxu0 }
 0x286   : > { %v1697_v24 = vadd.f32 %v1696_v18, %v1493_v48 }
 0x2ba   : > { %v1928_v16 = vpop.f32.mrf.mxu1 }
 0x2bb   : > { %v1937_v44 = vadd.f32 %v1928_v16, %v1691_v15 }
 0x2bc   : > { %v1930_v42 = vpop.f32.mrf.mxu1 }
 0x2bd   : > { %v1941_v21 = vadd.f32 %v2658_v20, %v1937_v44  ;;  %v1938_v22 = vadd.f32 %v1930_v42, %v1693_v17 }
 0x2be   : > { %v1932_v23 = vpop.f32.mrf.mxu1 }
 0x2bf   : > { %1945 = vst [vmem:[%s339_s19] sm:$0xff] %v1941_v21  ;;  %v1942_v27 = vadd.f32 %v2659_v25, %v1938_v22  ;;  %v1939_v28 = vadd.f32 %v1932_v23, %v1695_v19 }
 0x2c0   : > { %v1934_v29 = vpop.f32.mrf.mxu1 }
 0x2c1   : > { %1946 = vst [vmem:[%s339_s19 + $0x8] sm:$0xff] %v1942_v27  ;;  %v1943_v31 = vadd.f32 %v2660_v30, %v1939_v28  ;;  %v1940_v32 = vadd.f32 %v1934_v29, %v1697_v24 }
 0x2c3   : > { %1947 = vst [vmem:[%s339_s19 + $0x10] sm:$0xff] %v1943_v31  ;;  %v1944_v34 = vadd.f32 %v2661_v33, %v1940_v32 }
 0x2c5   : > { %1948 = vst [vmem:[%s339_s19 + $0x18] sm:$0xff] %v1944_v34 }
 0x2c6   : > { %2781 = shalt.err (!%p2778_p3)
}
 0x2c7   : > { %s2782_s22 = scalar_lea.hbm %s3167_s1, 512  ;;  %s2786_s12 = scalar_lea.hbm %s3218_s7, 1024 }
 0x2c8   : > { %p2783_p2 = scmp.ne.s32.totalorder %s3167_s1, %s2782_s22  ;;  %p2787_p5 = scmp.lt.s32.totalorder %s3167_s1, %s3218_s7 }
 0x2c9   : > { %p2788_p4 = scmp.lt.s32.totalorder %s2786_s12, %s2782_s22 }
 0x2ca   : > { %p2784_p9 = pnand %p2783_p2, %p3240_p12 }
 0x2cb   : > { %p2789_p6 = por %p2788_p4, %p2787_p5 }
 0x2cc   : > { %p2785_p11 = pneg %p2784_p9 }
 0x2ce   : > { %p2790_p8 = pnand %p2789_p6, %p2785_p11 }
 0x2d0   : > { %2793 = shalt.err (!%p2790_p8)
}
 0x2d1   : > { %s2852_s15 = smov 256   ;;  %s2853_s20 = smov 16  }
 0x2d2   : > { %2300 = dma.vmem_to_hbm [thread:$0]  (%p3240_p12), %s3161_s29, 512, %s3167_s1, %s1950_s28, %s2852_s15, %s2852_s15, %s2853_s20  }
 0x2d3 PF: > { %s1979_s21 = sand.u32 1, %s2828_s24   ;;  %p3241_p7 = scmp.ne.s32.totalorder %s3225_s8, 0 }
 0x2d4   : > { %p3242_p10 = scmp.ge.s32.totalorder %s2840_s27, 2  ;;  %s1980_s30 = scalar_lea.sflag [#allocation4], %s1979_s21 }
 0x2d6   : > { %p2317_p13 = pnand %p3242_p10, %p3241_p7 }
 0x2d8   : > { %p2318_p0 = pneg %p2317_p13 }
 0x2da   : > { %2823 = dma.done.wait (%p2318_p0), %s1980_s30, 512  }
 0x2db   : > { %2825 = vsyncadd (%p2318_p0), %s1980_s30, 4294966784  ;;  %p22_p1 = scmp.ge.s32.totalorder %s2974_s13, 4   ;;  %s3243_s24 = smov %s2832_s25 }
 0x2dc   : > { %s3244_s25 = smov %s2836_s26  ;;  %s3245_s26 = smov %s2984_s17 }
 0x2dd   : > { %s3246_s27 = smov %s2974_s13  ;;  %24 = sbr.rel (!%p22_p1) target bundleno = 9 (0x9), region = 109 }
 0x2e2   :  { %1985 = vsyncpa [#allocation3], 1 }
 0x2e3   :  { %1987 = vsyncpa [#allocation3 + $0x1], 1 }
 0x2e4   :  { %1988 = vsyncpa [#allocation6], 1 }
 0x2e5   :  { %1989 = vsyncpa [#allocation9], 1 }
 0x2e6   :  { %1990 = vsyncpa [#allocation4], 1 }
 0x2e7   :  { %1992 = vsyncpa [#allocation4 + $0x1], 1 }

</bundles_post_ra>
